<compile_context>
chip_gen: v7x
topology: tpu7x:2x2x1
jax: 0.10.0
libtpu: 0.0.40
codegen_flags: <defaults>
</compile_context>

<pallas_src>
import jax
import jax.numpy as jnp
from jax.experimental import pallas as pl
from jax.experimental.pallas import tpu as pltpu

# ----------------------------- model config (small) -----------------------------
VOCAB = 100
B = 2             # batch
S = 16            # TODO(synk): reference pads to max_length=128; reduced for demo.
H = 32            # hidden size
N_HEADS = 4
D_HEAD = H // N_HEADS
INTER = 64        # FFN intermediate size
N_LAYERS = 2
LN_EPS = 1e-12    # BERT layernorm eps
_SQRT_2_OVER_PI = 0.7978845608028654


# ----------------------------- in-kernel helpers ---------------------------------
def _layernorm(x, g, b):
    mu = jnp.mean(x, axis=-1, keepdims=True)
    var = jnp.mean((x - mu) * (x - mu), axis=-1, keepdims=True)
    return (x - mu) * jax.lax.rsqrt(var + LN_EPS) * g + b


def _gelu(x):
    # tanh approximation (lands on the EUP slot).
    # TODO(synk): real BERT uses exact erf GELU; numerics differ slightly.
    return 0.5 * x * (1.0 + jnp.tanh(_SQRT_2_OVER_PI * (x + 0.044715 * x * x * x)))


# ----------------------------- fused encoder kernel ------------------------------
def _encoder_kernel(
    emb_ref, bias_ref, maskp_ref, embln_ref,
    wq_ref, wk_ref, wv_ref, wo_ref, hb_ref,
    w1_ref, b1_ref, w2_ref,
    out_ref,
    first_scr, x_scr,
):
    layer = pl.program_id(1)

    # ---- layer 0: embedding layernorm -> hidden_states[0] -------------------
    @pl.when(layer == 0)
    def _init():
        embln = embln_ref[...]                          # (2, H)
        first = _layernorm(emb_ref[0], embln[0:1], embln[1:2])
        first_scr[...] = first
        x_scr[...] = first

    x = x_scr[...]                                      # (S, H) f32
    xb = x.astype(jnp.bfloat16)

    # packed per-layer H-wide bias / LN slab
    hb = hb_ref[0]                                      # (9, H) f32
    bq, bk, bv, bo = hb[0:1], hb[1:2], hb[2:3], hb[3:4]
    ln1g, ln1b = hb[4:5], hb[5:6]
    b2 = hb[6:7]
    ln2g, ln2b = hb[7:8], hb[8:9]

    # ---- full-width QKV projections (bf16 MXU, f32 accumulate) ---------------
    q = jnp.dot(xb, wq_ref[0], preferred_element_type=jnp.float32) + bq   # (S, H)
    k = jnp.dot(xb, wk_ref[0], preferred_element_type=jnp.float32) + bk
    v = jnp.dot(xb, wv_ref[0], preferred_element_type=jnp.float32) + bv

    att_bias = bias_ref[0]                              # (1, S), layer-invariant
    scale = 1.0 / (D_HEAD ** 0.5)

    # ---- multi-head attention: heads split by static lane slices -------------
    ctx_parts = []
    for h in range(N_HEADS):
        lo, hi = h * D_HEAD, (h + 1) * D_HEAD
        qh = q[:, lo:hi].astype(jnp.bfloat16)           # (S, Dh)
        kh = k[:, lo:hi].astype(jnp.bfloat16)
        vh = v[:, lo:hi].astype(jnp.bfloat16)
        s = jnp.einsum("qd,kd->qk", qh, kh,
                       preferred_element_type=jnp.float32) * scale + att_bias
        s = s - jnp.max(s, axis=-1, keepdims=True)
        p = jnp.exp(s)
        p = p * pl.reciprocal(jnp.sum(p, axis=-1, keepdims=True), approx=True)
        ctx_parts.append(jnp.dot(p.astype(jnp.bfloat16), vh,
                                 preferred_element_type=jnp.float32))       # (S, Dh)
    ctx = jnp.concatenate(ctx_parts, axis=-1)           # (S, H) f32

    # ---- single output projection + residual + LN1 ---------------------------
    attn = jnp.dot(ctx.astype(jnp.bfloat16), wo_ref[0],
                   preferred_element_type=jnp.float32) + bo
    x1 = _layernorm(x + attn, ln1g, ln1b)

    # ---- feed-forward (GELU) + residual + LN2 ---------------------------------
    hmid = _gelu(jnp.dot(x1.astype(jnp.bfloat16), w1_ref[0],
                         preferred_element_type=jnp.float32) + b1_ref[0])
    ffn = jnp.dot(hmid.astype(jnp.bfloat16), w2_ref[0],
                  preferred_element_type=jnp.float32) + b2
    x2 = _layernorm(x1 + ffn, ln2g, ln2b)
    x_scr[...] = x2

    # ---- last layer: masked pool of (first + last) / 2 ------------------------
    @pl.when(layer == N_LAYERS - 1)
    def _finalize():
        pooled = jnp.sum(maskp_ref[0] * (first_scr[...] + x2) * 0.5,
                         axis=0, keepdims=True)          # (1, H)
        out_ref[...] = pooled.reshape(1, 1, H)


# ----------------------------- parameter init -------------------------------------
def init_params(key):
    ks = jax.random.split(key, 9)

    def nrm(k, shape, dtype=jnp.float32):
        return (jax.random.normal(k, shape, jnp.float32) * 0.02).astype(dtype)

    L = N_LAYERS
    # embedding layernorm slab: row 0 = gamma, row 1 = beta
    emb_ln = jnp.concatenate([jnp.ones((1, H), jnp.float32),
                              jnp.zeros((1, H), jnp.float32)], axis=0)
    # per-layer H-wide slab rows: [bq, bk, bv, bo, ln1_g, ln1_b, b2, ln2_g, ln2_b]
    hbias = jnp.zeros((L, 9, H), jnp.float32)
    hbias = hbias.at[:, 4, :].set(1.0)   # ln1_g
    hbias = hbias.at[:, 7, :].set(1.0)   # ln2_g
    return {
        "word_emb": nrm(ks[0], (VOCAB, H)),
        "pos_emb": nrm(ks[1], (S, H)),
        "type_emb": nrm(ks[2], (2, H)),
        "emb_ln": emb_ln,
        # full-width bf16 matmul weights (cast to f32 accumulation at the dot)
        "wq": nrm(ks[3], (L, H, H), jnp.bfloat16),
        "wk": nrm(ks[4], (L, H, H), jnp.bfloat16),
        "wv": nrm(ks[5], (L, H, H), jnp.bfloat16),
        "wo": nrm(ks[6], (L, H, H), jnp.bfloat16),
        "hbias": hbias,
        "w1": nrm(ks[7], (L, H, INTER), jnp.bfloat16),
        "b1": jnp.zeros((L, 1, INTER), jnp.float32),
        "w2": nrm(ks[8], (L, INTER, H), jnp.bfloat16),
    }


# ----------------------------- forward pass ----------------------------------------
@jax.jit
def encoder_forward(params, input_ids, attention_mask):
    # TODO(synk): BertTokenizer (strings -> padded ids) and the pretrained
    # bert-base-uncased weights have no Pallas equivalent; ids + mask are inputs.
    mask_f = attention_mask.astype(jnp.float32)

    # embedding gather stays in XLA; everything downstream is ONE fused Pallas call.
    emb = (jnp.take(params["word_emb"], input_ids, axis=0)
           + params["pos_emb"][None, :, :]
           + params["type_emb"][0][None, None, :])                   # (B, S, H)
    att_bias = (1.0 - mask_f)[:, None, :] * (-1e9)                   # (B, 1, S)
    mask_pool = mask_f[:, :, None]                                   # (B, S, 1)

    per_batch3 = lambda b, l: (b, 0, 0)
    shared2 = lambda b, l: (0, 0)
    per_layer3 = lambda b, l: (l, 0, 0)

    grid_spec = pltpu.PrefetchScalarGridSpec(
        num_scalar_prefetch=0,
        grid=(B, N_LAYERS),
        in_specs=[
            pl.BlockSpec((1, S, H), per_batch3),          # emb (pre-LN)
            pl.BlockSpec((1, 1, S), per_batch3),          # additive attention bias
            pl.BlockSpec((1, S, 1), per_batch3),          # pooling mask
            pl.BlockSpec((2, H), shared2),                # emb LN gamma/beta slab
            pl.BlockSpec((1, H, H), per_layer3),          # wq (bf16)
            pl.BlockSpec((1, H, H), per_layer3),          # wk (bf16)
            pl.BlockSpec((1, H, H), per_layer3),          # wv (bf16)
            pl.BlockSpec((1, H, H), per_layer3),          # wo (bf16)
            pl.BlockSpec((1, 9, H), per_layer3),          # packed bias/LN slab
            pl.BlockSpec((1, H, INTER), per_layer3),      # w1 (bf16)
            pl.BlockSpec((1, 1, INTER), per_layer3),      # b1
            pl.BlockSpec((1, INTER, H), per_layer3),      # w2 (bf16)
        ],
        out_specs=pl.BlockSpec((1, 1, H), per_batch3),
        scratch_shapes=[
            pltpu.VMEM((S, H), jnp.float32),   # hidden_states[0] (per batch tile)
            pltpu.VMEM((S, H), jnp.float32),   # running hidden state (carry)
        ],
    )

    out = pl.pallas_call(
        _encoder_kernel,
        out_shape=jax.ShapeDtypeStruct((B, 1, H), jnp.float32),
        grid_spec=grid_spec,
        compiler_params=pltpu.CompilerParams(
            # batch axis parallel -> uses both TensorCores on v7x; layer axis is a
            # sequential carry.  Explicit VMEM budget so the layer-streamed weights
            # keep double-buffering when scaled toward real BERT sizes.
            dimension_semantics=("parallel", "arbitrary"),
            vmem_limit_bytes=64 * 1024 * 1024),
    )(emb, att_bias, mask_pool, params["emb_ln"],
      params["wq"], params["wk"], params["wv"], params["wo"], params["hbias"],
      params["w1"], params["b1"], params["w2"])
    return out.reshape(B, H)


# ----------------------------- main ------------------------------------------------
if __name__ == "__main__":
    key = jax.random.PRNGKey(0)
    k_param, k_ids = jax.random.split(key)

    params = init_params(k_param)

    input_ids = jax.random.randint(k_ids, (B, S), 0, VOCAB, dtype=jnp.int32)
    # simulate padded batch (lengths 12 and 9)
    lengths = jnp.array([12, 9], dtype=jnp.int32)
    attention_mask = (jnp.arange(S)[None, :] < lengths[:, None]).astype(jnp.int32)

    out = encoder_forward(params, input_ids, attention_mask)
    out = jax.block_until_ready(out)
    assert out.shape == (B, H) and out.dtype == jnp.float32
    print("KERNEL_OK")
</pallas_src>

<mosaic_0001>
module attributes {stable_mosaic.version = 11 : i64} {
  func.func @_encoder_kernel(%arg0: i32, %arg1: i32, %arg2: memref<1x16x32xf32, #tpu.memory_space<vmem>>, %arg3: memref<1x1x16xf32, #tpu.memory_space<vmem>>, %arg4: memref<1x16x1xf32, #tpu.memory_space<vmem>>, %arg5: memref<2x32xf32, #tpu.memory_space<vmem>>, %arg6: memref<1x32x32xbf16, #tpu.memory_space<vmem>>, %arg7: memref<1x32x32xbf16, #tpu.memory_space<vmem>>, %arg8: memref<1x32x32xbf16, #tpu.memory_space<vmem>>, %arg9: memref<1x32x32xbf16, #tpu.memory_space<vmem>>, %arg10: memref<1x9x32xf32, #tpu.memory_space<vmem>>, %arg11: memref<1x32x64xbf16, #tpu.memory_space<vmem>>, %arg12: memref<1x1x64xf32, #tpu.memory_space<vmem>>, %arg13: memref<1x64x32xbf16, #tpu.memory_space<vmem>>, %arg14: memref<1x1x32xf32, #tpu.memory_space<vmem>>, %arg15: memref<16x32xf32, #tpu.memory_space<vmem>>, %arg16: memref<16x32xf32, #tpu.memory_space<vmem>>) attributes {dimension_semantics = [#tpu.dimension_semantics<parallel>, #tpu.dimension_semantics<arbitrary>], iteration_bounds = array<i64: 2, 2>, scalar_prefetch = 0 : i64, scratch_operands = 2 : i64, tpu.core_type = #tpu.core_type<tc>, window_params = [{transform_indices = @transform_0, window_bounds = array<i64: 1, 16, 32>}, {transform_indices = @transform_1, window_bounds = array<i64: 1, 1, 16>}, {transform_indices = @transform_2, window_bounds = array<i64: 1, 16, 1>}, {pipeline_mode = #tpu.pipeline_mode<synchronous>, transform_indices = @transform_3, window_bounds = array<i64: 2, 32>}, {transform_indices = @transform_4, window_bounds = array<i64: 1, 32, 32>}, {transform_indices = @transform_5, window_bounds = array<i64: 1, 32, 32>}, {transform_indices = @transform_6, window_bounds = array<i64: 1, 32, 32>}, {transform_indices = @transform_7, window_bounds = array<i64: 1, 32, 32>}, {transform_indices = @transform_8, window_bounds = array<i64: 1, 9, 32>}, {transform_indices = @transform_9, window_bounds = array<i64: 1, 32, 64>}, {transform_indices = @transform_10, window_bounds = array<i64: 1, 1, 64>}, {transform_indices = @transform_11, window_bounds = array<i64: 1, 64, 32>}, {transform_indices = @transform_12, window_bounds = array<i64: 1, 1, 32>}]} {
    %c0_i32 = arith.constant 0 : i32
    %0 = arith.cmpi eq, %arg1, %c0_i32 : i32
    %1 = arith.extui %0 : i1 to i32
    %c0_i32_0 = arith.constant 0 : i32
    %2 = arith.cmpi ne, %1, %c0_i32_0 : i32
    scf.if %2 {
      %c0_71 = arith.constant 0 : index
      %c0_72 = arith.constant 0 : index
      %213 = vector.load %arg5[%c0_71, %c0_72] : memref<2x32xf32, #tpu.memory_space<vmem>>, vector<2x32xf32>
      %c0_73 = arith.constant 0 : index
      %c0_74 = arith.constant 0 : index
      %c0_75 = arith.constant 0 : index
      %214 = vector.load %arg2[%c0_73, %c0_74, %c0_75] : memref<1x16x32xf32, #tpu.memory_space<vmem>>, vector<1x16x32xf32>
      %215 = vector.shape_cast %214 : vector<1x16x32xf32> to vector<16x32xf32>
      %216 = vector.extract_strided_slice %213 {offsets = [0, 0], sizes = [1, 32], strides = [1, 1]} : vector<2x32xf32> to vector<1x32xf32>
      %217 = vector.extract_strided_slice %213 {offsets = [1, 0], sizes = [1, 32], strides = [1, 1]} : vector<2x32xf32> to vector<1x32xf32>
      %cst_76 = arith.constant dense<0.000000e+00> : vector<16xf32>
      %218 = vector.multi_reduction <add>, %215, %cst_76 [1] : vector<16x32xf32> to vector<16xf32>
      %219 = vector.shape_cast %218 : vector<16xf32> to vector<16x1xf32>
      %cst_77 = arith.constant 3.200000e+01 : f32
      %220 = vector.broadcast %cst_77 : f32 to vector<16x1xf32>
      %221 = arith.divf %219, %220 : vector<16x1xf32>
      %222 = vector.broadcast %221 : vector<16x1xf32> to vector<16x32xf32>
      %223 = arith.subf %215, %222 : vector<16x32xf32>
      %224 = vector.broadcast %221 : vector<16x1xf32> to vector<16x32xf32>
      %225 = arith.subf %215, %224 : vector<16x32xf32>
      %226 = arith.mulf %223, %225 : vector<16x32xf32>
      %cst_78 = arith.constant dense<0.000000e+00> : vector<16xf32>
      %227 = vector.multi_reduction <add>, %226, %cst_78 [1] : vector<16x32xf32> to vector<16xf32>
      %228 = vector.shape_cast %227 : vector<16xf32> to vector<16x1xf32>
      %cst_79 = arith.constant 3.200000e+01 : f32
      %229 = vector.broadcast %cst_79 : f32 to vector<16x1xf32>
      %230 = arith.divf %228, %229 : vector<16x1xf32>
      %231 = vector.broadcast %221 : vector<16x1xf32> to vector<16x32xf32>
      %232 = arith.subf %215, %231 : vector<16x32xf32>
      %cst_80 = arith.constant 9.99999996E-13 : f32
      %233 = vector.broadcast %cst_80 : f32 to vector<16x1xf32>
      %234 = arith.addf %230, %233 : vector<16x1xf32>
      %235 = math.rsqrt %234 : vector<16x1xf32>
      %236 = vector.broadcast %235 : vector<16x1xf32> to vector<16x32xf32>
      %237 = arith.mulf %232, %236 : vector<16x32xf32>
      %238 = vector.broadcast %216 : vector<1x32xf32> to vector<16x32xf32>
      %239 = arith.mulf %237, %238 : vector<16x32xf32>
      %240 = vector.broadcast %217 : vector<1x32xf32> to vector<16x32xf32>
      %241 = arith.addf %239, %240 : vector<16x32xf32>
      %c0_81 = arith.constant 0 : index
      %c0_82 = arith.constant 0 : index
      %242 = vector.load %arg15[%c0_81, %c0_82] : memref<16x32xf32, #tpu.memory_space<vmem>>, vector<16x32xf32>
      tpu.vector_store %arg15[%c0_81, %c0_82], %241 {strides = array<i32>} : memref<16x32xf32, #tpu.memory_space<vmem>>, vector<16x32xf32>,
      %c0_83 = arith.constant 0 : index
      %c0_84 = arith.constant 0 : index
      %243 = vector.load %arg16[%c0_83, %c0_84] : memref<16x32xf32, #tpu.memory_space<vmem>>, vector<16x32xf32>
      tpu.vector_store %arg16[%c0_83, %c0_84], %241 {strides = array<i32>} : memref<16x32xf32, #tpu.memory_space<vmem>>, vector<16x32xf32>,
    } else {
    }
    %c0 = arith.constant 0 : index
    %c0_1 = arith.constant 0 : index
    %3 = vector.load %arg16[%c0, %c0_1] : memref<16x32xf32, #tpu.memory_space<vmem>>, vector<16x32xf32>
    %4 = arith.truncf %3 : vector<16x32xf32> to vector<16x32xbf16>
    %c0_2 = arith.constant 0 : index
    %c0_3 = arith.constant 0 : index
    %c0_4 = arith.constant 0 : index
    %5 = vector.load %arg10[%c0_2, %c0_3, %c0_4] : memref<1x9x32xf32, #tpu.memory_space<vmem>>, vector<1x9x32xf32>
    %6 = vector.shape_cast %5 : vector<1x9x32xf32> to vector<9x32xf32>
    %7 = vector.extract_strided_slice %6 {offsets = [0, 0], sizes = [1, 32], strides = [1, 1]} : vector<9x32xf32> to vector<1x32xf32>
    %8 = vector.extract_strided_slice %6 {offsets = [1, 0], sizes = [1, 32], strides = [1, 1]} : vector<9x32xf32> to vector<1x32xf32>
    %9 = vector.extract_strided_slice %6 {offsets = [2, 0], sizes = [1, 32], strides = [1, 1]} : vector<9x32xf32> to vector<1x32xf32>
    %10 = vector.extract_strided_slice %6 {offsets = [3, 0], sizes = [1, 32], strides = [1, 1]} : vector<9x32xf32> to vector<1x32xf32>
    %11 = vector.extract_strided_slice %6 {offsets = [4, 0], sizes = [1, 32], strides = [1, 1]} : vector<9x32xf32> to vector<1x32xf32>
    %12 = vector.extract_strided_slice %6 {offsets = [5, 0], sizes = [1, 32], strides = [1, 1]} : vector<9x32xf32> to vector<1x32xf32>
    %13 = vector.extract_strided_slice %6 {offsets = [6, 0], sizes = [1, 32], strides = [1, 1]} : vector<9x32xf32> to vector<1x32xf32>
    %14 = vector.extract_strided_slice %6 {offsets = [7, 0], sizes = [1, 32], strides = [1, 1]} : vector<9x32xf32> to vector<1x32xf32>
    %15 = vector.extract_strided_slice %6 {offsets = [8, 0], sizes = [1, 32], strides = [1, 1]} : vector<9x32xf32> to vector<1x32xf32>
    %c0_5 = arith.constant 0 : index
    %c0_6 = arith.constant 0 : index
    %c0_7 = arith.constant 0 : index
    %16 = vector.load %arg6[%c0_5, %c0_6, %c0_7] : memref<1x32x32xbf16, #tpu.memory_space<vmem>>, vector<1x32x32xbf16>
    %17 = vector.shape_cast %16 : vector<1x32x32xbf16> to vector<32x32xbf16>
    %cst = arith.constant dense<0.000000e+00> : vector<16x32xf32>
    %18 = tpu.matmul %4, %17, %cst {dimension_numbers = #tpu.dot_dimension_numbers<[1], [0], [0], [1], [0, 0, 1, 1], [], []>} : vector<16x32xbf16>, vector<32x32xbf16>, vector<16x32xf32> -> vector<16x32xf32>
    %19 = vector.broadcast %7 : vector<1x32xf32> to vector<16x32xf32>
    %20 = arith.addf %18, %19 : vector<16x32xf32>
    %c0_8 = arith.constant 0 : index
    %c0_9 = arith.constant 0 : index
    %c0_10 = arith.constant 0 : index
    %21 = vector.load %arg7[%c0_8, %c0_9, %c0_10] : memref<1x32x32xbf16, #tpu.memory_space<vmem>>, vector<1x32x32xbf16>
    %22 = vector.shape_cast %21 : vector<1x32x32xbf16> to vector<32x32xbf16>
    %cst_11 = arith.constant dense<0.000000e+00> : vector<16x32xf32>
    %23 = tpu.matmul %4, %22, %cst_11 {dimension_numbers = #tpu.dot_dimension_numbers<[1], [0], [0], [1], [0, 0, 1, 1], [], []>} : vector<16x32xbf16>, vector<32x32xbf16>, vector<16x32xf32> -> vector<16x32xf32>
    %24 = vector.broadcast %8 : vector<1x32xf32> to vector<16x32xf32>
    %25 = arith.addf %23, %24 : vector<16x32xf32>
    %c0_12 = arith.constant 0 : index
    %c0_13 = arith.constant 0 : index
    %c0_14 = arith.constant 0 : index
    %26 = vector.load %arg8[%c0_12, %c0_13, %c0_14] : memref<1x32x32xbf16, #tpu.memory_space<vmem>>, vector<1x32x32xbf16>
    %27 = vector.shape_cast %26 : vector<1x32x32xbf16> to vector<32x32xbf16>
    %cst_15 = arith.constant dense<0.000000e+00> : vector<16x32xf32>
    %28 = tpu.matmul %4, %27, %cst_15 {dimension_numbers = #tpu.dot_dimension_numbers<[1], [0], [0], [1], [0, 0, 1, 1], [], []>} : vector<16x32xbf16>, vector<32x32xbf16>, vector<16x32xf32> -> vector<16x32xf32>
    %29 = vector.broadcast %9 : vector<1x32xf32> to vector<16x32xf32>
    %30 = arith.addf %28, %29 : vector<16x32xf32>
    %c0_16 = arith.constant 0 : index
    %c0_17 = arith.constant 0 : index
    %c0_18 = arith.constant 0 : index
    %31 = vector.load %arg3[%c0_16, %c0_17, %c0_18] : memref<1x1x16xf32, #tpu.memory_space<vmem>>, vector<1x1x16xf32>
    %32 = vector.shape_cast %31 : vector<1x1x16xf32> to vector<1x16xf32>
    %33 = vector.extract_strided_slice %20 {offsets = [0, 0], sizes = [16, 8], strides = [1, 1]} : vector<16x32xf32> to vector<16x8xf32>
    %34 = arith.truncf %33 : vector<16x8xf32> to vector<16x8xbf16>
    %35 = vector.extract_strided_slice %25 {offsets = [0, 0], sizes = [16, 8], strides = [1, 1]} : vector<16x32xf32> to vector<16x8xf32>
    %36 = arith.truncf %35 : vector<16x8xf32> to vector<16x8xbf16>
    %37 = vector.extract_strided_slice %30 {offsets = [0, 0], sizes = [16, 8], strides = [1, 1]} : vector<16x32xf32> to vector<16x8xf32>
    %38 = arith.truncf %37 : vector<16x8xf32> to vector<16x8xbf16>
    "tpu.trace_start"() <{level = 10 : i32, message = "qd,kd->qk"}> : () -> ()
    %cst_19 = arith.constant dense<0.000000e+00> : vector<16x16xf32>
    %39 = tpu.matmul %34, %36, %cst_19 {dimension_numbers = #tpu.dot_dimension_numbers<[1], [1], [0], [0], [0, 0, 1, 0], [], []>} : vector<16x8xbf16>, vector<16x8xbf16>, vector<16x16xf32> -> vector<16x16xf32>
    "tpu.trace_stop"() : () -> ()
    %cst_20 = arith.constant 0.353553385 : f32
    %40 = vector.broadcast %cst_20 : f32 to vector<16x16xf32>
    %41 = arith.mulf %39, %40 : vector<16x16xf32>
    %42 = vector.broadcast %32 : vector<1x16xf32> to vector<16x16xf32>
    %43 = arith.addf %41, %42 : vector<16x16xf32>
    %cst_21 = arith.constant dense<0xFF800000> : vector<16xf32>
    %44 = vector.multi_reduction <maximumf>, %43, %cst_21 [1] : vector<16x16xf32> to vector<16xf32>
    %45 = vector.shape_cast %44 : vector<16xf32> to vector<16x1xf32>
    %46 = vector.broadcast %45 : vector<16x1xf32> to vector<16x16xf32>
    %47 = arith.subf %43, %46 : vector<16x16xf32>
    %48 = math.exp %47 : vector<16x16xf32>
    %cst_22 = arith.constant dense<0.000000e+00> : vector<16xf32>
    %49 = vector.multi_reduction <add>, %48, %cst_22 [1] : vector<16x16xf32> to vector<16xf32>
    %50 = vector.shape_cast %49 : vector<16xf32> to vector<16x1xf32>
    %51 = tpu.reciprocal %50 {approx = true} : vector<16x1xf32> -> vector<16x1xf32>
    %52 = vector.broadcast %51 : vector<16x1xf32> to vector<16x16xf32>
    %53 = arith.mulf %48, %52 : vector<16x16xf32>
    %54 = arith.truncf %53 : vector<16x16xf32> to vector<16x16xbf16>
    %cst_23 = arith.constant dense<0.000000e+00> : vector<16x8xf32>
    %55 = tpu.matmul %54, %38, %cst_23 {dimension_numbers = #tpu.dot_dimension_numbers<[1], [0], [0], [1], [0, 0, 1, 1], [], []>} : vector<16x16xbf16>, vector<16x8xbf16>, vector<16x8xf32> -> vector<16x8xf32>
    %56 = vector.extract_strided_slice %20 {offsets = [0, 8], sizes = [16, 8], strides = [1, 1]} : vector<16x32xf32> to vector<16x8xf32>
    %57 = arith.truncf %56 : vector<16x8xf32> to vector<16x8xbf16>
    %58 = vector.extract_strided_slice %25 {offsets = [0, 8], sizes = [16, 8], strides = [1, 1]} : vector<16x32xf32> to vector<16x8xf32>
    %59 = arith.truncf %58 : vector<16x8xf32> to vector<16x8xbf16>
    %60 = vector.extract_strided_slice %30 {offsets = [0, 8], sizes = [16, 8], strides = [1, 1]} : vector<16x32xf32> to vector<16x8xf32>
    %61 = arith.truncf %60 : vector<16x8xf32> to vector<16x8xbf16>
    "tpu.trace_start"() <{level = 10 : i32, message = "qd,kd->qk"}> : () -> ()
    %cst_24 = arith.constant dense<0.000000e+00> : vector<16x16xf32>
    %62 = tpu.matmul %57, %59, %cst_24 {dimension_numbers = #tpu.dot_dimension_numbers<[1], [1], [0], [0], [0, 0, 1, 0], [], []>} : vector<16x8xbf16>, vector<16x8xbf16>, vector<16x16xf32> -> vector<16x16xf32>
    "tpu.trace_stop"() : () -> ()
    %cst_25 = arith.constant 0.353553385 : f32
    %63 = vector.broadcast %cst_25 : f32 to vector<16x16xf32>
    %64 = arith.mulf %62, %63 : vector<16x16xf32>
    %65 = vector.broadcast %32 : vector<1x16xf32> to vector<16x16xf32>
    %66 = arith.addf %64, %65 : vector<16x16xf32>
    %cst_26 = arith.constant dense<0xFF800000> : vector<16xf32>
    %67 = vector.multi_reduction <maximumf>, %66, %cst_26 [1] : vector<16x16xf32> to vector<16xf32>
    %68 = vector.shape_cast %67 : vector<16xf32> to vector<16x1xf32>
    %69 = vector.broadcast %68 : vector<16x1xf32> to vector<16x16xf32>
    %70 = arith.subf %66, %69 : vector<16x16xf32>
    %71 = math.exp %70 : vector<16x16xf32>
    %cst_27 = arith.constant dense<0.000000e+00> : vector<16xf32>
    %72 = vector.multi_reduction <add>, %71, %cst_27 [1] : vector<16x16xf32> to vector<16xf32>
    %73 = vector.shape_cast %72 : vector<16xf32> to vector<16x1xf32>
    %74 = tpu.reciprocal %73 {approx = true} : vector<16x1xf32> -> vector<16x1xf32>
    %75 = vector.broadcast %74 : vector<16x1xf32> to vector<16x16xf32>
    %76 = arith.mulf %71, %75 : vector<16x16xf32>
    %77 = arith.truncf %76 : vector<16x16xf32> to vector<16x16xbf16>
    %cst_28 = arith.constant dense<0.000000e+00> : vector<16x8xf32>
    %78 = tpu.matmul %77, %61, %cst_28 {dimension_numbers = #tpu.dot_dimension_numbers<[1], [0], [0], [1], [0, 0, 1, 1], [], []>} : vector<16x16xbf16>, vector<16x8xbf16>, vector<16x8xf32> -> vector<16x8xf32>
    %79 = vector.extract_strided_slice %20 {offsets = [0, 16], sizes = [16, 8], strides = [1, 1]} : vector<16x32xf32> to vector<16x8xf32>
    %80 = arith.truncf %79 : vector<16x8xf32> to vector<16x8xbf16>
    %81 = vector.extract_strided_slice %25 {offsets = [0, 16], sizes = [16, 8], strides = [1, 1]} : vector<16x32xf32> to vector<16x8xf32>
    %82 = arith.truncf %81 : vector<16x8xf32> to vector<16x8xbf16>
    %83 = vector.extract_strided_slice %30 {offsets = [0, 16], sizes = [16, 8], strides = [1, 1]} : vector<16x32xf32> to vector<16x8xf32>
    %84 = arith.truncf %83 : vector<16x8xf32> to vector<16x8xbf16>
    "tpu.trace_start"() <{level = 10 : i32, message = "qd,kd->qk"}> : () -> ()
    %cst_29 = arith.constant dense<0.000000e+00> : vector<16x16xf32>
    %85 = tpu.matmul %80, %82, %cst_29 {dimension_numbers = #tpu.dot_dimension_numbers<[1], [1], [0], [0], [0, 0, 1, 0], [], []>} : vector<16x8xbf16>, vector<16x8xbf16>, vector<16x16xf32> -> vector<16x16xf32>
    "tpu.trace_stop"() : () -> ()
    %cst_30 = arith.constant 0.353553385 : f32
    %86 = vector.broadcast %cst_30 : f32 to vector<16x16xf32>
    %87 = arith.mulf %85, %86 : vector<16x16xf32>
    %88 = vector.broadcast %32 : vector<1x16xf32> to vector<16x16xf32>
    %89 = arith.addf %87, %88 : vector<16x16xf32>
    %cst_31 = arith.constant dense<0xFF800000> : vector<16xf32>
    %90 = vector.multi_reduction <maximumf>, %89, %cst_31 [1] : vector<16x16xf32> to vector<16xf32>
    %91 = vector.shape_cast %90 : vector<16xf32> to vector<16x1xf32>
    %92 = vector.broadcast %91 : vector<16x1xf32> to vector<16x16xf32>
    %93 = arith.subf %89, %92 : vector<16x16xf32>
    %94 = math.exp %93 : vector<16x16xf32>
    %cst_32 = arith.constant dense<0.000000e+00> : vector<16xf32>
    %95 = vector.multi_reduction <add>, %94, %cst_32 [1] : vector<16x16xf32> to vector<16xf32>
    %96 = vector.shape_cast %95 : vector<16xf32> to vector<16x1xf32>
    %97 = tpu.reciprocal %96 {approx = true} : vector<16x1xf32> -> vector<16x1xf32>
    %98 = vector.broadcast %97 : vector<16x1xf32> to vector<16x16xf32>
    %99 = arith.mulf %94, %98 : vector<16x16xf32>
    %100 = arith.truncf %99 : vector<16x16xf32> to vector<16x16xbf16>
    %cst_33 = arith.constant dense<0.000000e+00> : vector<16x8xf32>
    %101 = tpu.matmul %100, %84, %cst_33 {dimension_numbers = #tpu.dot_dimension_numbers<[1], [0], [0], [1], [0, 0, 1, 1], [], []>} : vector<16x16xbf16>, vector<16x8xbf16>, vector<16x8xf32> -> vector<16x8xf32>
    %102 = vector.extract_strided_slice %20 {offsets = [0, 24], sizes = [16, 8], strides = [1, 1]} : vector<16x32xf32> to vector<16x8xf32>
    %103 = arith.truncf %102 : vector<16x8xf32> to vector<16x8xbf16>
    %104 = vector.extract_strided_slice %25 {offsets = [0, 24], sizes = [16, 8], strides = [1, 1]} : vector<16x32xf32> to vector<16x8xf32>
    %105 = arith.truncf %104 : vector<16x8xf32> to vector<16x8xbf16>
    %106 = vector.extract_strided_slice %30 {offsets = [0, 24], sizes = [16, 8], strides = [1, 1]} : vector<16x32xf32> to vector<16x8xf32>
    %107 = arith.truncf %106 : vector<16x8xf32> to vector<16x8xbf16>
    "tpu.trace_start"() <{level = 10 : i32, message = "qd,kd->qk"}> : () -> ()
    %cst_34 = arith.constant dense<0.000000e+00> : vector<16x16xf32>
    %108 = tpu.matmul %103, %105, %cst_34 {dimension_numbers = #tpu.dot_dimension_numbers<[1], [1], [0], [0], [0, 0, 1, 0], [], []>} : vector<16x8xbf16>, vector<16x8xbf16>, vector<16x16xf32> -> vector<16x16xf32>
    "tpu.trace_stop"() : () -> ()
    %cst_35 = arith.constant 0.353553385 : f32
    %109 = vector.broadcast %cst_35 : f32 to vector<16x16xf32>
    %110 = arith.mulf %108, %109 : vector<16x16xf32>
    %111 = vector.broadcast %32 : vector<1x16xf32> to vector<16x16xf32>
    %112 = arith.addf %110, %111 : vector<16x16xf32>
    %cst_36 = arith.constant dense<0xFF800000> : vector<16xf32>
    %113 = vector.multi_reduction <maximumf>, %112, %cst_36 [1] : vector<16x16xf32> to vector<16xf32>
    %114 = vector.shape_cast %113 : vector<16xf32> to vector<16x1xf32>
    %115 = vector.broadcast %114 : vector<16x1xf32> to vector<16x16xf32>
    %116 = arith.subf %112, %115 : vector<16x16xf32>
    %117 = math.exp %116 : vector<16x16xf32>
    %cst_37 = arith.constant dense<0.000000e+00> : vector<16xf32>
    %118 = vector.multi_reduction <add>, %117, %cst_37 [1] : vector<16x16xf32> to vector<16xf32>
    %119 = vector.shape_cast %118 : vector<16xf32> to vector<16x1xf32>
    %120 = tpu.reciprocal %119 {approx = true} : vector<16x1xf32> -> vector<16x1xf32>
    %121 = vector.broadcast %120 : vector<16x1xf32> to vector<16x16xf32>
    %122 = arith.mulf %117, %121 : vector<16x16xf32>
    %123 = arith.truncf %122 : vector<16x16xf32> to vector<16x16xbf16>
    %cst_38 = arith.constant dense<0.000000e+00> : vector<16x8xf32>
    %124 = tpu.matmul %123, %107, %cst_38 {dimension_numbers = #tpu.dot_dimension_numbers<[1], [0], [0], [1], [0, 0, 1, 1], [], []>} : vector<16x16xbf16>, vector<16x8xbf16>, vector<16x8xf32> -> vector<16x8xf32>
    %125 = tpu.concatenate %55, %78, %101, %124 in 1 : vector<16x8xf32>, vector<16x8xf32>, vector<16x8xf32>, vector<16x8xf32> -> vector<16x32xf32>
    %126 = arith.truncf %125 : vector<16x32xf32> to vector<16x32xbf16>
    %c0_39 = arith.constant 0 : index
    %c0_40 = arith.constant 0 : index
    %c0_41 = arith.constant 0 : index
    %127 = vector.load %arg9[%c0_39, %c0_40, %c0_41] : memref<1x32x32xbf16, #tpu.memory_space<vmem>>, vector<1x32x32xbf16>
    %128 = vector.shape_cast %127 : vector<1x32x32xbf16> to vector<32x32xbf16>
    %cst_42 = arith.constant dense<0.000000e+00> : vector<16x32xf32>
    %129 = tpu.matmul %126, %128, %cst_42 {dimension_numbers = #tpu.dot_dimension_numbers<[1], [0], [0], [1], [0, 0, 1, 1], [], []>} : vector<16x32xbf16>, vector<32x32xbf16>, vector<16x32xf32> -> vector<16x32xf32>
    %130 = vector.broadcast %10 : vector<1x32xf32> to vector<16x32xf32>
    %131 = arith.addf %129, %130 : vector<16x32xf32>
    %132 = arith.addf %3, %131 : vector<16x32xf32>
    %cst_43 = arith.constant dense<0.000000e+00> : vector<16xf32>
    %133 = vector.multi_reduction <add>, %132, %cst_43 [1] : vector<16x32xf32> to vector<16xf32>
    %134 = vector.shape_cast %133 : vector<16xf32> to vector<16x1xf32>
    %cst_44 = arith.constant 3.200000e+01 : f32
    %135 = vector.broadcast %cst_44 : f32 to vector<16x1xf32>
    %136 = arith.divf %134, %135 : vector<16x1xf32>
    %137 = vector.broadcast %136 : vector<16x1xf32> to vector<16x32xf32>
    %138 = arith.subf %132, %137 : vector<16x32xf32>
    %139 = vector.broadcast %136 : vector<16x1xf32> to vector<16x32xf32>
    %140 = arith.subf %132, %139 : vector<16x32xf32>
    %141 = arith.mulf %138, %140 : vector<16x32xf32>
    %cst_45 = arith.constant dense<0.000000e+00> : vector<16xf32>
    %142 = vector.multi_reduction <add>, %141, %cst_45 [1] : vector<16x32xf32> to vector<16xf32>
    %143 = vector.shape_cast %142 : vector<16xf32> to vector<16x1xf32>
    %cst_46 = arith.constant 3.200000e+01 : f32
    %144 = vector.broadcast %cst_46 : f32 to vector<16x1xf32>
    %145 = arith.divf %143, %144 : vector<16x1xf32>
    %146 = vector.broadcast %136 : vector<16x1xf32> to vector<16x32xf32>
    %147 = arith.subf %132, %146 : vector<16x32xf32>
    %cst_47 = arith.constant 9.99999996E-13 : f32
    %148 = vector.broadcast %cst_47 : f32 to vector<16x1xf32>
    %149 = arith.addf %145, %148 : vector<16x1xf32>
    %150 = math.rsqrt %149 : vector<16x1xf32>
    %151 = vector.broadcast %150 : vector<16x1xf32> to vector<16x32xf32>
    %152 = arith.mulf %147, %151 : vector<16x32xf32>
    %153 = vector.broadcast %11 : vector<1x32xf32> to vector<16x32xf32>
    %154 = arith.mulf %152, %153 : vector<16x32xf32>
    %155 = vector.broadcast %12 : vector<1x32xf32> to vector<16x32xf32>
    %156 = arith.addf %154, %155 : vector<16x32xf32>
    %157 = arith.truncf %156 : vector<16x32xf32> to vector<16x32xbf16>
    %c0_48 = arith.constant 0 : index
    %c0_49 = arith.constant 0 : index
    %c0_50 = arith.constant 0 : index
    %158 = vector.load %arg11[%c0_48, %c0_49, %c0_50] : memref<1x32x64xbf16, #tpu.memory_space<vmem>>, vector<1x32x64xbf16>
    %159 = vector.shape_cast %158 : vector<1x32x64xbf16> to vector<32x64xbf16>
    %cst_51 = arith.constant dense<0.000000e+00> : vector<16x64xf32>
    %160 = tpu.matmul %157, %159, %cst_51 {dimension_numbers = #tpu.dot_dimension_numbers<[1], [0], [0], [1], [0, 0, 1, 1], [], []>} : vector<16x32xbf16>, vector<32x64xbf16>, vector<16x64xf32> -> vector<16x64xf32>
    %c0_52 = arith.constant 0 : index
    %c0_53 = arith.constant 0 : index
    %c0_54 = arith.constant 0 : index
    %161 = vector.load %arg12[%c0_52, %c0_53, %c0_54] : memref<1x1x64xf32, #tpu.memory_space<vmem>>, vector<1x1x64xf32>
    %162 = vector.shape_cast %161 : vector<1x1x64xf32> to vector<1x64xf32>
    %163 = vector.broadcast %162 : vector<1x64xf32> to vector<16x64xf32>
    %164 = arith.addf %160, %163 : vector<16x64xf32>
    %cst_55 = arith.constant 5.000000e-01 : f32
    %165 = vector.broadcast %cst_55 : f32 to vector<16x64xf32>
    %166 = arith.mulf %165, %164 : vector<16x64xf32>
    %cst_56 = arith.constant 4.471500e-02 : f32
    %167 = vector.broadcast %cst_56 : f32 to vector<16x64xf32>
    %168 = arith.mulf %167, %164 : vector<16x64xf32>
    %169 = arith.mulf %168, %164 : vector<16x64xf32>
    %170 = arith.mulf %169, %164 : vector<16x64xf32>
    %171 = arith.addf %164, %170 : vector<16x64xf32>
    %cst_57 = arith.constant 0.797884583 : f32
    %172 = vector.broadcast %cst_57 : f32 to vector<16x64xf32>
    %173 = arith.mulf %172, %171 : vector<16x64xf32>
    %174 = math.tanh %173 : vector<16x64xf32>
    %cst_58 = arith.constant 1.000000e+00 : f32
    %175 = vector.broadcast %cst_58 : f32 to vector<16x64xf32>
    %176 = arith.addf %175, %174 : vector<16x64xf32>
    %177 = arith.mulf %166, %176 : vector<16x64xf32>
    %178 = arith.truncf %177 : vector<16x64xf32> to vector<16x64xbf16>
    %c0_59 = arith.constant 0 : index
    %c0_60 = arith.constant 0 : index
    %c0_61 = arith.constant 0 : index
    %179 = vector.load %arg13[%c0_59, %c0_60, %c0_61] : memref<1x64x32xbf16, #tpu.memory_space<vmem>>, vector<1x64x32xbf16>
    %180 = vector.shape_cast %179 : vector<1x64x32xbf16> to vector<64x32xbf16>
    %cst_62 = arith.constant dense<0.000000e+00> : vector<16x32xf32>
    %181 = tpu.matmul %178, %180, %cst_62 {dimension_numbers = #tpu.dot_dimension_numbers<[1], [0], [0], [1], [0, 0, 1, 1], [], []>} : vector<16x64xbf16>, vector<64x32xbf16>, vector<16x32xf32> -> vector<16x32xf32>
    %182 = vector.broadcast %13 : vector<1x32xf32> to vector<16x32xf32>
    %183 = arith.addf %181, %182 : vector<16x32xf32>
    %184 = arith.addf %156, %183 : vector<16x32xf32>
    %cst_63 = arith.constant dense<0.000000e+00> : vector<16xf32>
    %185 = vector.multi_reduction <add>, %184, %cst_63 [1] : vector<16x32xf32> to vector<16xf32>
    %186 = vector.shape_cast %185 : vector<16xf32> to vector<16x1xf32>
    %cst_64 = arith.constant 3.200000e+01 : f32
    %187 = vector.broadcast %cst_64 : f32 to vector<16x1xf32>
    %188 = arith.divf %186, %187 : vector<16x1xf32>
    %189 = vector.broadcast %188 : vector<16x1xf32> to vector<16x32xf32>
    %190 = arith.subf %184, %189 : vector<16x32xf32>
    %191 = vector.broadcast %188 : vector<16x1xf32> to vector<16x32xf32>
    %192 = arith.subf %184, %191 : vector<16x32xf32>
    %193 = arith.mulf %190, %192 : vector<16x32xf32>
    %cst_65 = arith.constant dense<0.000000e+00> : vector<16xf32>
    %194 = vector.multi_reduction <add>, %193, %cst_65 [1] : vector<16x32xf32> to vector<16xf32>
    %195 = vector.shape_cast %194 : vector<16xf32> to vector<16x1xf32>
    %cst_66 = arith.constant 3.200000e+01 : f32
    %196 = vector.broadcast %cst_66 : f32 to vector<16x1xf32>
    %197 = arith.divf %195, %196 : vector<16x1xf32>
    %198 = vector.broadcast %188 : vector<16x1xf32> to vector<16x32xf32>
    %199 = arith.subf %184, %198 : vector<16x32xf32>
    %cst_67 = arith.constant 9.99999996E-13 : f32
    %200 = vector.broadcast %cst_67 : f32 to vector<16x1xf32>
    %201 = arith.addf %197, %200 : vector<16x1xf32>
    %202 = math.rsqrt %201 : vector<16x1xf32>
    %203 = vector.broadcast %202 : vector<16x1xf32> to vector<16x32xf32>
    %204 = arith.mulf %199, %203 : vector<16x32xf32>
    %205 = vector.broadcast %14 : vector<1x32xf32> to vector<16x32xf32>
    %206 = arith.mulf %204, %205 : vector<16x32xf32>
    %207 = vector.broadcast %15 : vector<1x32xf32> to vector<16x32xf32>
    %208 = arith.addf %206, %207 : vector<16x32xf32>
    %c0_68 = arith.constant 0 : index
    %c0_69 = arith.constant 0 : index
    %209 = vector.load %arg16[%c0_68, %c0_69] : memref<16x32xf32, #tpu.memory_space<vmem>>, vector<16x32xf32>
    tpu.vector_store %arg16[%c0_68, %c0_69], %208 {strides = array<i32>} : memref<16x32xf32, #tpu.memory_space<vmem>>, vector<16x32xf32>,
    %c1_i32 = arith.constant 1 : i32
    %210 = arith.cmpi eq, %arg1, %c1_i32 : i32
    %211 = arith.extui %210 : i1 to i32
    %c0_i32_70 = arith.constant 0 : i32
    %212 = arith.cmpi ne, %211, %c0_i32_70 : i32
    scf.if %212 {
      %c0_71 = arith.constant 0 : index
      %c0_72 = arith.constant 0 : index
      %c0_73 = arith.constant 0 : index
      %213 = vector.load %arg4[%c0_71, %c0_72, %c0_73] : memref<1x16x1xf32, #tpu.memory_space<vmem>>, vector<1x16x1xf32>
      %214 = vector.shape_cast %213 : vector<1x16x1xf32> to vector<16x1xf32>
      %c0_74 = arith.constant 0 : index
      %c0_75 = arith.constant 0 : index
      %215 = vector.load %arg15[%c0_74, %c0_75] : memref<16x32xf32, #tpu.memory_space<vmem>>, vector<16x32xf32>
      %216 = arith.addf %215, %208 : vector<16x32xf32>
      %217 = vector.broadcast %214 : vector<16x1xf32> to vector<16x32xf32>
      %218 = arith.mulf %217, %216 : vector<16x32xf32>
      %cst_76 = arith.constant 5.000000e-01 : f32
      %219 = vector.broadcast %cst_76 : f32 to vector<16x32xf32>
      %220 = arith.mulf %218, %219 : vector<16x32xf32>
      %cst_77 = arith.constant dense<0.000000e+00> : vector<32xf32>
      %221 = vector.multi_reduction <add>, %220, %cst_77 [0] : vector<16x32xf32> to vector<32xf32>
      %222 = vector.shape_cast %221 : vector<32xf32> to vector<1x32xf32>
      %223 = vector.shape_cast %222 : vector<1x32xf32> to vector<1x1x32xf32>
      %c0_78 = arith.constant 0 : index
      %c0_79 = arith.constant 0 : index
      %c0_80 = arith.constant 0 : index
      %224 = vector.load %arg14[%c0_78, %c0_79, %c0_80] : memref<1x1x32xf32, #tpu.memory_space<vmem>>, vector<1x1x32xf32>
      tpu.vector_store %arg14[%c0_78, %c0_79, %c0_80], %223 {strides = array<i32>} : memref<1x1x32xf32, #tpu.memory_space<vmem>>, vector<1x1x32xf32>,
    } else {
    }
    return
  }
  func.func @transform_0(%arg0: i32, %arg1: i32) -> (i32, i32, i32) {
    %c0_i32 = arith.constant 0 : i32
    %c0_i32_0 = arith.constant 0 : i32
    %c0_i32_1 = arith.constant 0 : i32
    return %arg0, %c0_i32, %c0_i32_0 : i32, i32, i32
  }
  func.func @transform_1(%arg0: i32, %arg1: i32) -> (i32, i32, i32) {
    %c0_i32 = arith.constant 0 : i32
    %c0_i32_0 = arith.constant 0 : i32
    %c0_i32_1 = arith.constant 0 : i32
    return %arg0, %c0_i32, %c0_i32_0 : i32, i32, i32
  }
  func.func @transform_2(%arg0: i32, %arg1: i32) -> (i32, i32, i32) {
    %c0_i32 = arith.constant 0 : i32
    %c0_i32_0 = arith.constant 0 : i32
    %c0_i32_1 = arith.constant 0 : i32
    return %arg0, %c0_i32, %c0_i32_0 : i32, i32, i32
  }
  func.func @transform_3(%arg0: i32, %arg1: i32) -> (i32, i32) {
    %c0_i32 = arith.constant 0 : i32
    %c0_i32_0 = arith.constant 0 : i32
    %c0_i32_1 = arith.constant 0 : i32
    return %c0_i32, %c0_i32_0 : i32, i32
  }
  func.func @transform_4(%arg0: i32, %arg1: i32) -> (i32, i32, i32) {
    %c0_i32 = arith.constant 0 : i32
    %c0_i32_0 = arith.constant 0 : i32
    %c0_i32_1 = arith.constant 0 : i32
    return %arg1, %c0_i32, %c0_i32_0 : i32, i32, i32
  }
  func.func @transform_5(%arg0: i32, %arg1: i32) -> (i32, i32, i32) {
    %c0_i32 = arith.constant 0 : i32
    %c0_i32_0 = arith.constant 0 : i32
    %c0_i32_1 = arith.constant 0 : i32
    return %arg1, %c0_i32, %c0_i32_0 : i32, i32, i32
  }
  func.func @transform_6(%arg0: i32, %arg1: i32) -> (i32, i32, i32) {
    %c0_i32 = arith.constant 0 : i32
    %c0_i32_0 = arith.constant 0 : i32
    %c0_i32_1 = arith.constant 0 : i32
    return %arg1, %c0_i32, %c0_i32_0 : i32, i32, i32
  }
  func.func @transform_7(%arg0: i32, %arg1: i32) -> (i32, i32, i32) {
    %c0_i32 = arith.constant 0 : i32
    %c0_i32_0 = arith.constant 0 : i32
    %c0_i32_1 = arith.constant 0 : i32
    return %arg1, %c0_i32, %c0_i32_0 : i32, i32, i32
  }
  func.func @transform_8(%arg0: i32, %arg1: i32) -> (i32, i32, i32) {
    %c0_i32 = arith.constant 0 : i32
    %c0_i32_0 = arith.constant 0 : i32
    %c0_i32_1 = arith.constant 0 : i32
    return %arg1, %c0_i32, %c0_i32_0 : i32, i32, i32
  }
  func.func @transform_9(%arg0: i32, %arg1: i32) -> (i32, i32, i32) {
    %c0_i32 = arith.constant 0 : i32
    %c0_i32_0 = arith.constant 0 : i32
    %c0_i32_1 = arith.constant 0 : i32
    return %arg1, %c0_i32, %c0_i32_0 : i32, i32, i32
  }
  func.func @transform_10(%arg0: i32, %arg1: i32) -> (i32, i32, i32) {
    %c0_i32 = arith.constant 0 : i32
    %c0_i32_0 = arith.constant 0 : i32
    %c0_i32_1 = arith.constant 0 : i32
    return %arg1, %c0_i32, %c0_i32_0 : i32, i32, i32
  }
  func.func @transform_11(%arg0: i32, %arg1: i32) -> (i32, i32, i32) {
    %c0_i32 = arith.constant 0 : i32
    %c0_i32_0 = arith.constant 0 : i32
    %c0_i32_1 = arith.constant 0 : i32
    return %arg1, %c0_i32, %c0_i32_0 : i32, i32, i32
  }
  func.func @transform_12(%arg0: i32, %arg1: i32) -> (i32, i32, i32) {
    %c0_i32 = arith.constant 0 : i32
    %c0_i32_0 = arith.constant 0 : i32
    %c0_i32_1 = arith.constant 0 : i32
    return %arg0, %c0_i32, %c0_i32_0 : i32, i32, i32
  }
}

</mosaic_0001>

<bundles_post_ra>
// kernel: encoder_forward.1
= control target key start
LH: loop header
LB: loop body
LE: loop exit
PB: predicated region body
PF: predicated region fallthrough
CT: control target
= control target key end

     0   :  { %s4261_s0 = inlined_call_operand.hbm [shape: f32[2,16,32], index: 0, kind: input, shape index: {}]   ;;  %s4262_s1 = inlined_call_operand.hbm [shape: f32[2,1,16], index: 1, kind: input, shape index: {}]   ;;  %s4263_s2 = inlined_call_operand.hbm [shape: f32[2,16,1], index: 2, kind: input, shape index: {}]   ;;  %s4264_s3 = inlined_call_operand.hbm [shape: f32[2,32], index: 3, kind: input, shape index: {}]   ;;  %s4265_s4 = inlined_call_operand.hbm [shape: bf16[2,32,32], index: 4, kind: input, shape index: {}]   ;;  %s4266_s5 = inlined_call_operand.hbm [shape: bf16[2,32,32], index: 5, kind: input, shape index: {}]   ;;  %s4267_s6 = inlined_call_operand.hbm [shape: bf16[2,32,32], index: 6, kind: input, shape index: {}]   ;;  %s4268_s7 = inlined_call_operand.hbm [shape: bf16[2,32,32], index: 7, kind: input, shape index: {}]   ;;  %s4269_s8 = inlined_call_operand.hbm [shape: f32[2,9,32], index: 8, kind: input, shape index: {}]   ;;  %s4270_s9 = inlined_call_operand.hbm [shape: bf16[2,32,64], index: 9, kind: input, shape index: {}]   ;;  %s4271_s10 = inlined_call_operand.hbm [shape: f32[2,1,64], index: 10, kind: input, shape index: {}]   ;;  %s4272_s11 = inlined_call_operand.hbm [shape: bf16[2,64,32], index: 11, kind: input, shape index: {}]   ;;  %s4273_s12 = inlined_call_operand.hbm [shape: f32[2,1,32], index: 12, kind: output, shape index: {}]  }
   0x1   :  { %4304 = sst [smem:[#allocation44_spill]] %s4261_s0 }
   0x2   :  { %4305 = sst [smem:[#allocation45_spill]] %s4262_s1 }
   0x3   :  { %4306 = sst [smem:[#allocation46_spill]] %s4263_s2 }
   0x4   :  { %4307 = sst [smem:[#allocation47_spill]] %s4264_s3 }
   0x5   :  { %4308 = sst [smem:[#allocation48_spill]] %s4265_s4 }
   0x6   :  { %4309 = sst [smem:[#allocation49_spill]] %s4266_s5 }
   0x7   :  { %4310 = sst [smem:[#allocation50_spill]] %s4267_s6 }
   0x8   :  { %4311 = sst [smem:[#allocation51_spill]] %s4268_s7 }
   0x9   :  { %4312 = sst [smem:[#allocation52_spill]] %s4269_s8 }
   0xa   :  { %4313 = sst [smem:[#allocation53_spill]] %s4270_s9 }
   0xb   :  { %4314 = sst [smem:[#allocation54_spill]] %s4271_s10 }
   0xc   :  { %4315 = sst [smem:[#allocation55_spill]] %s4272_s11 }
   0xd   :  { %4316 = sst [smem:[#allocation56_spill]] %s4273_s12 }
   0xe   :  { %17 = vsyncpa [#allocation5], 0 }
   0xf   :  { %19 = vsyncpa [#allocation5 + $0x1], 0 }
  0x10   :  { %20 = vsyncpa [#allocation8], 0 }
  0x11   :  { %22 = vsyncpa [#allocation8 + $0x1], 0 }
  0x12   :  { %23 = vsyncpa [#allocation11], 0 }
  0x13   :  { %24 = vsyncpa [#allocation6], 0 }
  0x14   :  { %26 = vsyncpa [#allocation6 + $0x1], 0  ;;  %s3341_s21 = smov 0   ;;  %s3343_s22 = smov 0  }
  0x15   :  { %s3345_s23 = smov 0   ;;  %s3347_s24 = smov 0  }
  0x16   :  { %s3349_s25 = smov 0   ;;  %s3351_s26 = smov 0  }
  0x17   :  { %s3353_s27 = smov 0   ;;  %s3355_s28 = smov 0  }
  0x18   :  { %s3357_s29 = smov 0   ;;  %s3359_s30 = smov 0  }
  0x19   :  { %s3361_s13 = smov 0  }
  0x1a LB: > { %4317 = sst [smem:[#allocation33_spill]] %s3208_s21  ;;  %s41_s14 = sadd.s32 1, %s3240_s29  ;;  %s3248_s13 = sphi %s3361_s13, %s32_s13   ;;  %s3244_s30 = sphi %s3359_s30, %s4392_s30   ;;  %s3240_s29 = sphi %s3357_s29, %s4396_s29   ;;  %s3236_s28 = sphi %s3355_s28, %s4390_s28   ;;  %s3232_s27 = sphi %s3353_s27, %s4395_s27   ;;  %s3228_s26 = sphi %s3351_s26, %s4389_s26   ;;  %s3224_s25 = sphi %s3349_s25, %s4394_s25   ;;  %s3220_s24 = sphi %s3347_s24, %s4393_s24   ;;  %s3216_s23 = sphi %s3345_s23, %s4387_s23   ;;  %s3212_s22 = sphi %s3343_s22, %s4386_s22   ;;  %s3208_s21 = sphi %s3341_s21, %s4385_s21  }
  0x1b   : > { %4318 = sst [smem:[#allocation34_spill]] %s3212_s22  ;;  %s44_s15 = sadd.s32 1, %s3244_s30 }
  0x1c   : > { %4319 = sst [smem:[#allocation35_spill]] %s3216_s23  ;;  %p42_p0 = scmp.ge.s32.totalorder %s41_s14, 2 }
  0x1d   : > { %4320 = sst [smem:[#allocation36_spill]] %s3228_s26  ;;  %s51_s16 = sadd.s32 1, %s3228_s26 }
  0x1e   : > { %4321 = sst [smem:[#allocation37_spill]] %s3232_s27  ;;  %p4282_p1 = scmp.ne.s32.totalorder %s3228_s26, %s3224_s25 }
  0x1f   : > { %4322 = sst [smem:[#allocation38_spill]] %s3236_s28  ;;  %p59_p2 = scmp.eq.s32.totalorder %s3248_s13, 0 }
  0x20   : > { %4323 = sst [smem:[#allocation39_spill]] %s3244_s30  ;;  %s4398_s14 = smov (%p42_p0, %s41_s14), 0 }
  0x21   : > { %4324 = sst [smem:[#allocation40_spill]] %s4398_s14  ;;  %s4400_s15 = smov (!%p42_p0, %s44_s15), %s3244_s30 }
  0x22   : > { %p3408_p3 = por %p59_p2, %p4282_p1  ;;  %s147_s18 = ssub.s32 %s3240_s29, %s4398_s14 }
  0x23   : > { %p46_p4 = scmp.ge.s32.totalorder %s4400_s15, 2  ;;  %p148_p5 = scmp.eq.s32.totalorder %s147_s18, 0 }
  0x24   : > { %s150_s19 = sadd.s32 1, %s3216_s23  ;;  %p157_p6 = scmp.ne.s32.totalorder %s3216_s23, %s3212_s22 }
  0x25   : > { %s4402_s15 = smov (%p46_p4, %s4400_s15), 0  ;;  %p4283_p9 = scmp.lt.s32.totalorder %s3248_s13, 4 }
  0x26   : > { %4326 = sst [smem:[#allocation41_spill]] %s4402_s15  ;;  %s48_s12 = ssub.s32 %s3244_s30, %s4402_s15 }
  0x27   : > { %s3420_s20 = scalar_select %p148_p5, %s3216_s23, %s150_s19  }
  0x28   : > { %p3424_p7 = por %p157_p6, %p59_p2  ;;  %p49_p8 = scmp.eq.s32.totalorder %s48_s12, 0 }
  0x29   : > { %4327 = sst [smem:[#allocation42_spill]] %s3420_s20  ;;  %s408_s18 = sand.u32 1, %s3228_s26  }
  0x2a   : > { %s4328_s28 = scalar_select %p3424_p7, 1, 0 }
  0x2b   : > { %s3431_s14 = scalar_select %p49_p8, %s3228_s26, %s51_s16  }
  0x2c   : > { %p3438_p10 = pnand %p4283_p9, %p3408_p3  ;;  %s3442_s19 = sshll.u32 %s408_s18, 4 }
  0x2d   : > { %4329 = sst [smem:[#allocation43_spill]] %s3431_s14  ;;  %s410_s15 = scalar_lea.vmem [#allocation4], %s3442_s19 }
  0x2e   : > { %s417_s20 = sshll.u32 %s410_s15, 4  ;;  %s2256_s12 = sshll.u32 %s3244_s30, 4  ;;  %s3445_s20 = int_to_ptr.vmem [resolvable:$true] %s417_s20 }
  0x2f   : > { %s4331_s1 = sld [smem:[#allocation45_spill]]  ;;  %s430_s17 = scalar_lea.vmem [#allocation7], %s408_s18 }
  0x30   : > { %s437_s14 = sshll.u32 %s430_s17, 4  ;;  %s4332_s10 = sand.u32 1, %s3248_s13   ;;  %s3453_s14 = int_to_ptr.vmem [resolvable:$true] %s437_s14 }
  0x31   : > { %s3457_s26 = scalar_lea.sflag [#allocation8], %s4332_s10  ;;  %p3463_p12 = pneg %p3438_p10 }
  0x35   : > { %s3451_s16 = scalar_lea.hbm %s4331_s1, %s2256_s12  ;;  %s2733_s18 = scalar_lea.hbm %s4331_s1, 32 }
  0x36   : > { %s2728_s15 = scalar_lea.hbm %s3451_s16, 16  ;;  %p2734_p2 = scmp.lt.u32.totalorder %s3451_s16, %s4331_s1 }
  0x37   : > { %p2729_p11 = scmp.ne.s32.totalorder %s3451_s16, %s2728_s15  ;;  %p2735_p3 = scmp.lt.u32.totalorder %s2733_s18, %s2728_s15 }
  0x38   : > { %p2737_p5 = scmp.lt.u32.totalorder %s2728_s15, %s3451_s16 }
  0x39   : > { %p2731_p13 = pnand %p3463_p12, %p2729_p11  ;;  %p2736_p4 = por %p2735_p3, %p2734_p2 }
  0x3b   : > { %p2732_p0 = pneg %p2731_p13  ;;  %p2738_p6 = por %p2737_p5, %p2736_p4 }
  0x3d   : > { %p2739_p8 = pnand %p2738_p6, %p2732_p0 }
  0x3f   : > { %2742 = shalt.err (!%p2739_p8)
}
  0x40   : > { %s2743_s10 = scalar_lea.vmem %s3453_s14, 16  ;;  %s3250_s3 = smov [#allocation7]  }
  0x41   : > { %p2744_p11 = scmp.ne.s32.totalorder %s3453_s14, %s2743_s10  ;;  %s2748_s27 = sshll.u32 %s3250_s3, 4  ;;  %s2749_s27 = int_to_ptr.vmem [resolvable:$false] %s2748_s27 }
  0x42   : > { %s2750_s12 = scalar_lea.vmem %s2749_s27, 32  ;;  %p2751_p9 = scmp.lt.s32.totalorder %s3453_s14, %s2749_s27 }
  0x43   : > { %p2746_p13 = pnand %p2744_p11, %p3463_p12  ;;  %p2752_p7 = scmp.lt.s32.totalorder %s2750_s12, %s2743_s10 }
  0x45   : > { %p2747_p1 = pneg %p2746_p13  ;;  %p2753_p2 = por %p2752_p7, %p2751_p9 }
  0x47   : > { %p2754_p3 = pnand %p2753_p2, %p2747_p1 }
  0x49   : > { %2757 = shalt.err (!%p2754_p3)
}
  0x4a   : > { %2512 = dma.hbm_to_vmem [thread:$0]  (!%p3438_p10), %s3451_s16, 16, %s3453_s14, %s3457_s26  }
  0x4b   : > { %s448_s15 = scalar_lea.vmem [#allocation9], %s3442_s19  ;;  %p4334_p0 = scmp.ne.s32.totalorder %s4328_s28, 0 }
  0x4c   : > { %s455_s18 = sshll.u32 %s448_s15, 4  ;;  %p4335_p4 = scmp.lt.s32.totalorder %s3248_s13, 4  ;;  %s3496_s18 = int_to_ptr.vmem [resolvable:$true] %s455_s18 }
  0x4d   : > { %s2329_s10 = sshll.u32 %s3244_s30, 8  ;;  %s4337_s0 = sld [smem:[#allocation44_spill]] }
  0x4e   : > { %p3492_p5 = pnand %p4335_p4, %p4334_p0  ;;  %s4338_s2 = sld [smem:[#allocation46_spill]] }
  0x4f   : > { %s4339_s14 = sand.u32 1, %s3248_s13  }
  0x50   : > { %s4336_s17 = scalar_select %p3492_p5, 1, 0 }
  0x51   : > { %s3511_s19 = scalar_lea.sflag [#allocation5], %s4339_s14 }
  0x53   : > { %s3502_s12 = scalar_lea.hbm %s4337_s0, %s2329_s10  ;;  %s2763_s27 = scalar_lea.hbm %s4337_s0, 512 }
  0x54   : > { %s3507_s28 = scalar_lea.hbm %s4338_s2, %s2329_s10  ;;  %s2758_s16 = scalar_lea.hbm %s3502_s12, 256 }
  0x55   : > { %p2759_p1 = scmp.ne.s32.totalorder %s3502_s12, %s2758_s16  ;;  %p2764_p6 = scmp.lt.u32.totalorder %s3502_s12, %s4337_s0 }
  0x56   : > { %p2765_p8 = scmp.lt.u32.totalorder %s2763_s27, %s2758_s16  ;;  %p2767_p13 = scmp.lt.u32.totalorder %s2758_s16, %s3502_s12 }
  0x57   : > { %p2761_p7 = pnand %p2759_p1, %p3463_p12 }
  0x58   : > { %p2766_p11 = por %p2765_p8, %p2764_p6 }
  0x59   : > { %p2762_p9 = pneg %p2761_p7 }
  0x5a   : > { %p2768_p2 = por %p2767_p13, %p2766_p11 }
  0x5c   : > { %p2769_p3 = pnand %p2768_p2, %p2762_p9 }
  0x5e   : > { %2772 = shalt.err (!%p2769_p3)
}
  0x5f   : > { %s2773_s21 = scalar_lea.vmem %s3445_s20, 256  ;;  %s3251_s10 = smov [#allocation4]  }
  0x60   : > { %p2774_p0 = scmp.ne.s32.totalorder %s3445_s20, %s2773_s21  ;;  %s2778_s14 = sshll.u32 %s3251_s10, 4  ;;  %s2779_s14 = int_to_ptr.vmem [resolvable:$false] %s2778_s14 }
  0x61   : > { %s2780_s30 = scalar_lea.vmem %s2779_s14, 512  ;;  %p2781_p7 = scmp.lt.s32.totalorder %s3445_s20, %s2779_s14 }
  0x62   : > { %p2776_p4 = pnand %p2774_p0, %p3463_p12  ;;  %p2782_p5 = scmp.lt.s32.totalorder %s2780_s30, %s2773_s21 }
  0x64   : > { %p2777_p1 = pneg %p2776_p4  ;;  %p2783_p6 = por %p2782_p5, %p2781_p7 }
  0x66   : > { %p2784_p8 = pnand %p2783_p6, %p2777_p1 }
  0x68   : > { %2787 = shalt.err (!%p2784_p8)
}
  0x69   : > { %s4286_s16 = smov 128   ;;  %s4287_s15 = smov 8  }
  0x6a   : > { %2509 = dma.hbm_to_vmem [thread:$0]  (!%p3438_p10), %s3502_s12, 256, %s3445_s20, %s3511_s19, %s4286_s16, %s4286_s16, %s4287_s15  }
  0x6b   : > { %s2788_s3 = scalar_lea.hbm %s3507_s28, 256  ;;  %s2793_s21 = scalar_lea.hbm %s4338_s2, 512 }
  0x6c   : > { %p2789_p5 = scmp.ne.s32.totalorder %s3507_s28, %s2788_s3  ;;  %p2794_p13 = scmp.lt.u32.totalorder %s3507_s28, %s4338_s2 }
  0x6d   : > { %p2795_p2 = scmp.lt.u32.totalorder %s2793_s21, %s2788_s3  ;;  %p2797_p0 = scmp.lt.u32.totalorder %s2788_s3, %s3507_s28 }
  0x6e   : > { %p2791_p9 = pnand %p2789_p5, %p3463_p12 }
  0x6f   : > { %p2796_p3 = por %p2795_p2, %p2794_p13 }
  0x70   : > { %p2792_p11 = pneg %p2791_p9 }
  0x71   : > { %p2798_p4 = por %p2797_p0, %p2796_p3 }
  0x73   : > { %p2799_p1 = pnand %p2798_p4, %p2792_p11 }
  0x75   : > { %2802 = shalt.err (!%p2799_p1)
}
  0x76   : > { %s2803_s20 = scalar_lea.vmem %s3496_s18, 256  ;;  %s3254_s12 = smov [#allocation9]  }
  0x77   : > { %p2804_p7 = scmp.ne.s32.totalorder %s3496_s18, %s2803_s20  ;;  %s2808_s30 = sshll.u32 %s3254_s12, 4  ;;  %s2809_s30 = int_to_ptr.vmem [resolvable:$false] %s2808_s30 }
  0x78   : > { %s2810_s27 = scalar_lea.vmem %s2809_s30, 512  ;;  %p2811_p5 = scmp.lt.s32.totalorder %s3496_s18, %s2809_s30 }
  0x79   : > { %p2806_p6 = pnand %p2804_p7, %p3463_p12  ;;  %p2812_p9 = scmp.lt.s32.totalorder %s2810_s27, %s2803_s20 }
  0x7b   : > { %p2807_p8 = pneg %p2806_p6  ;;  %p2813_p13 = por %p2812_p9, %p2811_p5 }
  0x7d   : > { %p2814_p2 = pnand %p2813_p13, %p2807_p8 }
  0x7f   : > { %2817 = shalt.err (!%p2814_p2)
}
  0x80   : > { %2515 = dma.hbm_to_vmem [thread:$0]  (!%p3438_p10), %s3507_s28, 256, %s3496_s18, %s3457_s26, %s4286_s16, %s4286_s16, %s4287_s15  }
  0x81   : > { %s3564_s22 = sand.u32 1, %s3216_s23   ;;  %s3567_s3 = sshll.u32 %s3240_s29, 8 }
  0x82   : > { %s3570_s1 = sshll.u32 %s3564_s22, 4  ;;  %s4340_s4 = sld [smem:[#allocation48_spill]] }
  0x83   : > { %s469_s14 = scalar_lea.vmem [#allocation12], %s3570_s1  ;;  %p4341_p12 = scmp.ne.s32.totalorder %s4336_s17, 0 }
  0x84   : > { %s476_s18 = sshll.u32 %s469_s14, 4  ;;  %s3579_s18 = int_to_ptr.vmem [resolvable:$true] %s476_s18 }
  0x85   : > { %p3585_p11 = pneg %p4341_p12 }
  0x87   : > { %s4342_s20 = scalar_select %p3585_p11, 1, 0 }
  0x88   : > { %s3576_s10 = scalar_lea.hbm %s4340_s4, %s3567_s3  ;;  %s2823_s27 = scalar_lea.hbm %s4340_s4, 512 }
  0x89   : > { %s2818_s28 = scalar_lea.hbm %s3576_s10, 256  ;;  %p2824_p4 = scmp.lt.u32.totalorder %s3576_s10, %s4340_s4 }
  0x8a   : > { %p2819_p10 = scmp.ne.s32.totalorder %s3576_s10, %s2818_s28  ;;  %p2825_p1 = scmp.lt.u32.totalorder %s2823_s27, %s2818_s28 }
  0x8b   : > { %p2827_p6 = scmp.lt.u32.totalorder %s2818_s28, %s3576_s10 }
  0x8c   : > { %p2821_p3 = pnand %p3585_p11, %p2819_p10  ;;  %p2826_p7 = por %p2825_p1, %p2824_p4 }
  0x8e   : > { %p2822_p0 = pneg %p2821_p3  ;;  %p2828_p8 = por %p2827_p6, %p2826_p7 }
  0x90   : > { %p2829_p5 = pnand %p2828_p8, %p2822_p0 }
  0x92   : > { %2832 = shalt.err (!%p2829_p5)
}
  0x93   : > { %s2833_s14 = scalar_lea.vmem %s3579_s18, 256  ;;  %s3255_s12 = smov [#allocation12]  }
  0x94   : > { %p2834_p9 = scmp.ne.s32.totalorder %s3579_s18, %s2833_s14  ;;  %s2838_s30 = sshll.u32 %s3255_s12, 4  ;;  %s2839_s30 = int_to_ptr.vmem [resolvable:$false] %s2838_s30 }
  0x95   : > { %s2840_s21 = scalar_lea.vmem %s2839_s30, 512  ;;  %p2841_p10 = scmp.lt.s32.totalorder %s3579_s18, %s2839_s30 }
  0x96   : > { %p2836_p13 = pnand %p2834_p9, %p3585_p11  ;;  %p2842_p3 = scmp.lt.s32.totalorder %s2840_s21, %s2833_s14 }
  0x98   : > { %p2837_p2 = pneg %p2836_p13  ;;  %p2843_p4 = por %p2842_p3, %p2841_p10 }
  0x9a   : > { %p2844_p1 = pnand %p2843_p4, %p2837_p2 }
  0x9c   : > { %2847 = shalt.err (!%p2844_p1)
}
  0x9d   : > { %s4288_s28 = smov 64   ;;  %s4290_s27 = smov 4  }
  0x9e   : > { %2518 = dma.hbm_to_vmem [thread:$0]  (!%p4341_p12), %s3576_s10, 256, %s3579_s18, %s3511_s19, %s4288_s28, %s4288_s28, %s4290_s27  }
  0x9f   : > { %s4343_s5 = sld [smem:[#allocation49_spill]]  ;;  %s490_s30 = scalar_lea.vmem [#allocation13], %s3570_s1 }
  0xa0   : > { %s497_s21 = sshll.u32 %s490_s30, 4  ;;  %s3619_s21 = int_to_ptr.vmem [resolvable:$true] %s497_s21 }
  0xa5   : > { %s3616_s14 = scalar_lea.hbm %s4343_s5, %s3567_s3  ;;  %s2853_s18 = scalar_lea.hbm %s4343_s5, 512 }
  0xa6   : > { %s2848_s16 = scalar_lea.hbm %s3616_s14, 256  ;;  %p2854_p8 = scmp.lt.u32.totalorder %s3616_s14, %s4343_s5 }
  0xa7   : > { %p2849_p0 = scmp.ne.s32.totalorder %s3616_s14, %s2848_s16  ;;  %p2855_p5 = scmp.lt.u32.totalorder %s2853_s18, %s2848_s16 }
  0xa8   : > { %p2857_p13 = scmp.lt.u32.totalorder %s2848_s16, %s3616_s14 }
  0xa9   : > { %p2851_p7 = pnand %p2849_p0, %p3585_p11  ;;  %p2856_p9 = por %p2855_p5, %p2854_p8 }
  0xab   : > { %p2852_p6 = pneg %p2851_p7  ;;  %p2858_p2 = por %p2857_p13, %p2856_p9 }
  0xad   : > { %p2859_p10 = pnand %p2858_p2, %p2852_p6 }
  0xaf   : > { %2862 = shalt.err (!%p2859_p10)
}
  0xb0   : > { %s2863_s30 = scalar_lea.vmem %s3619_s21, 256  ;;  %s3258_s15 = smov [#allocation13]  }
  0xb1   : > { %p2864_p3 = scmp.ne.s32.totalorder %s3619_s21, %s2863_s30  ;;  %s2868_s10 = sshll.u32 %s3258_s15, 4  ;;  %s2869_s10 = int_to_ptr.vmem [resolvable:$false] %s2868_s10 }
  0xb2   : > { %s2870_s11 = scalar_lea.vmem %s2869_s10, 512  ;;  %p2871_p0 = scmp.lt.s32.totalorder %s3619_s21, %s2869_s10 }
  0xb3   : > { %p2866_p4 = pnand %p2864_p3, %p3585_p11  ;;  %p2872_p7 = scmp.lt.s32.totalorder %s2870_s11, %s2863_s30 }
  0xb5   : > { %p2867_p1 = pneg %p2866_p4  ;;  %p2873_p8 = por %p2872_p7, %p2871_p0 }
  0xb7   : > { %p2874_p5 = pnand %p2873_p8, %p2867_p1 }
  0xb9   : > { %2877 = shalt.err (!%p2874_p5)
}
  0xba   : > { %2521 = dma.hbm_to_vmem [thread:$0]  (!%p4341_p12), %s3616_s14, 256, %s3619_s21, %s3457_s26, %s4288_s28, %s4288_s28, %s4290_s27  }
  0xbb   : > { %s4344_s6 = sld [smem:[#allocation50_spill]]  ;;  %s511_s30 = scalar_lea.vmem [#allocation14], %s3570_s1 }
  0xbc   : > { %s518_s15 = sshll.u32 %s511_s30, 4  ;;  %s3653_s15 = int_to_ptr.vmem [resolvable:$true] %s518_s15 }
  0xc1   : > { %s3650_s12 = scalar_lea.hbm %s4344_s6, %s3567_s3  ;;  %s2883_s21 = scalar_lea.hbm %s4344_s6, 512 }
  0xc2   : > { %s2878_s10 = scalar_lea.hbm %s3650_s12, 256  ;;  %p2884_p2 = scmp.lt.u32.totalorder %s3650_s12, %s4344_s6 }
  0xc3   : > { %p2879_p6 = scmp.ne.s32.totalorder %s3650_s12, %s2878_s10  ;;  %p2885_p10 = scmp.lt.u32.totalorder %s2883_s21, %s2878_s10 }
  0xc4   : > { %p2887_p4 = scmp.lt.u32.totalorder %s2878_s10, %s3650_s12 }
  0xc5   : > { %p2881_p9 = pnand %p2879_p6, %p3585_p11  ;;  %p2886_p3 = por %p2885_p10, %p2884_p2 }
  0xc7   : > { %p2882_p13 = pneg %p2881_p9  ;;  %p2888_p1 = por %p2887_p4, %p2886_p3 }
  0xc9   : > { %p2889_p0 = pnand %p2888_p1, %p2882_p13 }
  0xcb   : > { %2892 = shalt.err (!%p2889_p0)
}
  0xcc   : > { %s2893_s30 = scalar_lea.vmem %s3653_s15, 256  ;;  %s3259_s11 = smov [#allocation14]  }
  0xcd   : > { %p2894_p7 = scmp.ne.s32.totalorder %s3653_s15, %s2893_s30  ;;  %s2898_s14 = sshll.u32 %s3259_s11, 4  ;;  %s2899_s14 = int_to_ptr.vmem [resolvable:$false] %s2898_s14 }
  0xce   : > { %s2900_s16 = scalar_lea.vmem %s2899_s14, 512  ;;  %p2901_p6 = scmp.lt.s32.totalorder %s3653_s15, %s2899_s14 }
  0xcf   : > { %p2896_p8 = pnand %p2894_p7, %p3585_p11  ;;  %p2902_p9 = scmp.lt.s32.totalorder %s2900_s16, %s2893_s30 }
  0xd1   : > { %p2897_p5 = pneg %p2896_p8  ;;  %p2903_p2 = por %p2902_p9, %p2901_p6 }
  0xd3   : > { %p2904_p10 = pnand %p2903_p2, %p2897_p5 }
  0xd5   : > { %2907 = shalt.err (!%p2904_p10)
}
  0xd6   : > { %2524 = dma.hbm_to_vmem [thread:$0]  (!%p4341_p12), %s3650_s12, 256, %s3653_s15, %s3511_s19, %s4288_s28, %s4288_s28, %s4290_s27  }
  0xd7   : > { %s4345_s7 = sld [smem:[#allocation51_spill]]  ;;  %s532_s30 = scalar_lea.vmem [#allocation15], %s3570_s1 }
  0xd8   : > { %s539_s11 = sshll.u32 %s532_s30, 4  ;;  %s3687_s11 = int_to_ptr.vmem [resolvable:$true] %s539_s11 }
  0xdd   : > { %s3684_s18 = scalar_lea.hbm %s4345_s7, %s3567_s3  ;;  %s2913_s15 = scalar_lea.hbm %s4345_s7, 512 }
  0xde   : > { %s2908_s14 = scalar_lea.hbm %s3684_s18, 256  ;;  %p2914_p1 = scmp.lt.u32.totalorder %s3684_s18, %s4345_s7 }
  0xdf   : > { %p2909_p13 = scmp.ne.s32.totalorder %s3684_s18, %s2908_s14  ;;  %p2915_p0 = scmp.lt.u32.totalorder %s2913_s15, %s2908_s14 }
  0xe0   : > { %p2917_p8 = scmp.lt.u32.totalorder %s2908_s14, %s3684_s18 }
  0xe1   : > { %p2911_p3 = pnand %p2909_p13, %p3585_p11  ;;  %p2916_p7 = por %p2915_p0, %p2914_p1 }
  0xe3   : > { %p2912_p4 = pneg %p2911_p3  ;;  %p2918_p5 = por %p2917_p8, %p2916_p7 }
  0xe5   : > { %p2919_p6 = pnand %p2918_p5, %p2912_p4 }
  0xe7   : > { %2922 = shalt.err (!%p2919_p6)
}
  0xe8   : > { %s2923_s30 = scalar_lea.vmem %s3687_s11, 256  ;;  %s3260_s16 = smov [#allocation15]  }
  0xe9   : > { %p2924_p9 = scmp.ne.s32.totalorder %s3687_s11, %s2923_s30  ;;  %s2928_s12 = sshll.u32 %s3260_s16, 4  ;;  %s2929_s12 = int_to_ptr.vmem [resolvable:$false] %s2928_s12 }
  0xea   : > { %s2930_s10 = scalar_lea.vmem %s2929_s12, 512  ;;  %p2931_p13 = scmp.lt.s32.totalorder %s3687_s11, %s2929_s12 }
  0xeb   : > { %p2926_p2 = pnand %p2924_p9, %p3585_p11  ;;  %p2932_p3 = scmp.lt.s32.totalorder %s2930_s10, %s2923_s30 }
  0xed   : > { %p2927_p10 = pneg %p2926_p2  ;;  %p2933_p1 = por %p2932_p3, %p2931_p13 }
  0xef   : > { %p2934_p0 = pnand %p2933_p1, %p2927_p10 }
  0xf1   : > { %2937 = shalt.err (!%p2934_p0)
}
  0xf2   : > { %2527 = dma.hbm_to_vmem [thread:$0]  (!%p4341_p12), %s3684_s18, 256, %s3687_s11, %s3457_s26, %s4288_s28, %s4288_s28, %s4290_s27  }
  0xf3   : > { %s4346_s8 = sld [smem:[#allocation52_spill]]  ;;  %s553_s30 = scalar_lea.vmem [#allocation16], %s3570_s1 }
  0xf4   : > { %s560_s16 = sshll.u32 %s553_s30, 4  ;;  %s3721_s16 = int_to_ptr.vmem [resolvable:$true] %s560_s16 }
  0xf9   : > { %s3718_s21 = scalar_lea.hbm %s4346_s8, %s3567_s3  ;;  %s2943_s11 = scalar_lea.hbm %s4346_s8, 512 }
  0xfa   : > { %s2938_s12 = scalar_lea.hbm %s3718_s21, 256  ;;  %p2944_p5 = scmp.lt.u32.totalorder %s3718_s21, %s4346_s8 }
  0xfb   : > { %p2939_p4 = scmp.ne.s32.totalorder %s3718_s21, %s2938_s12  ;;  %p2945_p6 = scmp.lt.u32.totalorder %s2943_s11, %s2938_s12 }
  0xfc   : > { %p2947_p2 = scmp.lt.u32.totalorder %s2938_s12, %s3718_s21 }
  0xfd   : > { %p2941_p7 = pnand %p2939_p4, %p3585_p11  ;;  %p2946_p9 = por %p2945_p6, %p2944_p5 }
  0xff   : > { %p2942_p8 = pneg %p2941_p7  ;;  %p2948_p10 = por %p2947_p2, %p2946_p9 }
 0x101   : > { %p2949_p13 = pnand %p2948_p10, %p2942_p8 }
 0x103   : > { %2952 = shalt.err (!%p2949_p13)
}
 0x104   : > { %s2953_s30 = scalar_lea.vmem %s3721_s16, 256  ;;  %s3261_s10 = smov [#allocation16]  }
 0x105   : > { %p2954_p3 = scmp.ne.s32.totalorder %s3721_s16, %s2953_s30  ;;  %s2958_s18 = sshll.u32 %s3261_s10, 4  ;;  %s2959_s18 = int_to_ptr.vmem [resolvable:$false] %s2958_s18 }
 0x106   : > { %s2960_s14 = scalar_lea.vmem %s2959_s18, 512  ;;  %p2961_p4 = scmp.lt.s32.totalorder %s3721_s16, %s2959_s18 }
 0x107   : > { %p2956_p1 = pnand %p2954_p3, %p3585_p11  ;;  %p2962_p7 = scmp.lt.s32.totalorder %s2960_s14, %s2953_s30 }
 0x109   : > { %p2957_p0 = pneg %p2956_p1  ;;  %p2963_p5 = por %p2962_p7, %p2961_p4 }
 0x10b   : > { %p2964_p6 = pnand %p2963_p5, %p2957_p0 }
 0x10d   : > { %2967 = shalt.err (!%p2964_p6)
}
 0x10e   : > { %s4347_s12 = smov 8   ;;  %s4348_s11 = smov 128  }
 0x10f   : > { %2530 = dma.hbm_to_vmem [thread:$0]  (!%p4341_p12), %s3718_s21, 256, %s3721_s16, %s3511_s19, %s4348_s11, %s4348_s11, %s4347_s12  }
 0x110   : > { %s4349_s9 = sld [smem:[#allocation53_spill]]  ;;  %s574_s30 = scalar_lea.vmem [#allocation17], %s3570_s1 }
 0x111   : > { %s581_s14 = sshll.u32 %s574_s30, 4  ;;  %s3755_s14 = int_to_ptr.vmem [resolvable:$true] %s581_s14 }
 0x116   : > { %s3752_s18 = scalar_lea.hbm %s4349_s9, %s3567_s3  ;;  %s2973_s16 = scalar_lea.hbm %s4349_s9, 512 }
 0x117   : > { %s2968_s28 = scalar_lea.hbm %s3752_s18, 256  ;;  %p2974_p10 = scmp.lt.u32.totalorder %s3752_s18, %s4349_s9 }
 0x118   : > { %p2969_p8 = scmp.ne.s32.totalorder %s3752_s18, %s2968_s28  ;;  %p2975_p13 = scmp.lt.u32.totalorder %s2973_s16, %s2968_s28 }
 0x119   : > { %p2977_p1 = scmp.lt.u32.totalorder %s2968_s28, %s3752_s18 }
 0x11a   : > { %p2971_p9 = pnand %p2969_p8, %p3585_p11  ;;  %p2976_p3 = por %p2975_p13, %p2974_p10 }
 0x11c   : > { %p2972_p2 = pneg %p2971_p9  ;;  %p2978_p0 = por %p2977_p1, %p2976_p3 }
 0x11e   : > { %p2979_p4 = pnand %p2978_p0, %p2972_p2 }
 0x120   : > { %2982 = shalt.err (!%p2979_p4)
}
 0x121   : > { %s2983_s1 = scalar_lea.vmem %s3755_s14, 256  ;;  %s3262_s27 = smov [#allocation17]  }
 0x122   : > { %p2984_p7 = scmp.ne.s32.totalorder %s3755_s14, %s2983_s1  ;;  %s2988_s11 = sshll.u32 %s3262_s27, 4  ;;  %s2989_s11 = int_to_ptr.vmem [resolvable:$false] %s2988_s11 }
 0x123   : > { %s2990_s15 = scalar_lea.vmem %s2989_s11, 512  ;;  %p2991_p8 = scmp.lt.s32.totalorder %s3755_s14, %s2989_s11 }
 0x124   : > { %p2986_p5 = pnand %p2984_p7, %p3585_p11  ;;  %p2992_p9 = scmp.lt.s32.totalorder %s2990_s15, %s2983_s1 }
 0x126   : > { %p2987_p6 = pneg %p2986_p5  ;;  %p2993_p10 = por %p2992_p9, %p2991_p8 }
 0x128   : > { %p2994_p13 = pnand %p2993_p10, %p2987_p6 }
 0x12a   : > { %2997 = shalt.err (!%p2994_p13)
}
 0x12b   : > { %s4350_s28 = smov 4   ;;  %s4351_s10 = smov 64  }
 0x12c   : > { %s4352_s30 = sld [smem:[#allocation33_spill]]  ;;  %s4354_s16 = sld [smem:[#allocation36_spill]] }
 0x12d   : > { %s4353_s21 = sld [smem:[#allocation34_spill]]  ;;  %s3783_s12 = sadd.s32 4294967295, %s3248_s13  }
 0x12e   : > { %2533 = dma.hbm_to_vmem [thread:$0]  (!%p4341_p12), %s3752_s18, 256, %s3755_s14, %s3457_s26, %s4351_s10, %s4351_s10, %s4350_s28  }
 0x12f   : > { %s2249_s3 = sadd.s32 4294967294, %s3248_s13   ;;  %p64_p2 = scmp.ne.s32.totalorder %s3224_s25, %s3220_s24 }
 0x130   : > { %p4293_p3 = scmp.eq.s32.totalorder %s3783_s12, 0  ;;  %p369_p0 = scmp.eq.s32.totalorder %s3783_s12, 3 }
 0x131   : > { %p375_p4 = scmp.eq.s32.totalorder %s2249_s3, 3  ;;  %p2250_p10 = scmp.ge.s32.totalorder %s3248_s13, 1 }
 0x132   : > { %p3794_p7 = por %p4293_p3, %p64_p2  ;;  %p4357_p6 = scmp.ne.s32.totalorder %s4354_s16, %s3224_s25 }
 0x133   : > { %p163_p1 = scmp.ne.s32.totalorder %s4353_s21, %s4352_s30  ;;  %p3811_p9 = por %p375_p4, %p64_p2 }
 0x134   : > { %s4355_s1 = scalar_select %p3794_p7, 1, 0 }
 0x135   : > { %p3800_p5 = por %p163_p1, %p4293_p3  ;;  %p3807_p8 = por %p369_p0, %p4357_p6 }
 0x136   : > { %s4359_s27 = scalar_select %p3811_p9, 1, 0 }
 0x137   : > { %s4356_s18 = scalar_select %p3800_p5, 1, 0 }
 0x138   : > { %s4358_s14 = scalar_select %p3807_p8, 1, 0 }
 0x139   : > { %4360 = sst [smem:[#allocation33_spill]] %s4359_s27  ;;  %p382_p13 = scmp.lt.s32.totalorder %s3248_s13, 5 }
 0x13a   : > { %s3263_s15 = smov [#allocation10]   ;;  %s2278_s21 = sshll.u32 %s3240_s29, 4 }
 0x13b   : > { %p3817_p12 = pnand %p2250_p10, %p382_p13  ;;  %s395_s30 = sshll.u32 %s3263_s15, 4  ;;  %s3821_s30 = int_to_ptr.vmem [resolvable:$true] %s395_s30 }
 0x13c   : > { %s4362_s0 = sld [smem:[#allocation54_spill]]  ;;  %s594_s4 = scalar_lea.vmem [#allocation18], %s3564_s22 }
 0x13d   : > { %s4361_s11 = scalar_select %p3817_p12, 1, 0 }
 0x13e   : > { %p2502_p1 = pneg %p3817_p12  ;;  %s601_s5 = sshll.u32 %s594_s4, 4  ;;  %s602_s5 = int_to_ptr.vmem [resolvable:$true] %s601_s5 }
 0x140   : > { %p3834_p2 = pnand %p2502_p1, %p4293_p3 }
 0x142   : > { %s3829_s2 = scalar_lea.hbm %s4362_s0, %s2278_s21  ;;  %s3003_s3 = scalar_lea.hbm %s4362_s0, 32 }
 0x143   : > { %s4363_s6 = scalar_select %p3834_p2, 1, 0 }
 0x144   : > { %s2998_s15 = scalar_lea.hbm %s3829_s2, 16  ;;  %p3004_p10 = scmp.lt.u32.totalorder %s3829_s2, %s4362_s0 }
 0x145   : > { %p2999_p0 = scmp.ne.s32.totalorder %s3829_s2, %s2998_s15  ;;  %p3005_p13 = scmp.lt.u32.totalorder %s3003_s3, %s2998_s15 }
 0x146   : > { %p3007_p1 = scmp.lt.u32.totalorder %s2998_s15, %s3829_s2 }
 0x147   : > { %p3001_p4 = pnand %p2999_p0, %p3585_p11  ;;  %p3006_p9 = por %p3005_p13, %p3004_p10 }
 0x149   : > { %p3002_p6 = pneg %p3001_p4  ;;  %p3008_p3 = por %p3007_p1, %p3006_p9 }
 0x14b   : > { %p3009_p8 = pnand %p3008_p3, %p3002_p6 }
 0x14d   : > { %3012 = shalt.err (!%p3009_p8)
}
 0x14e   : > { %s3013_s4 = scalar_lea.vmem %s602_s5, 16  ;;  %s3264_s9 = smov [#allocation18]  }
 0x14f   : > { %p3014_p5 = scmp.ne.s32.totalorder %s602_s5, %s3013_s4  ;;  %s3018_s23 = sshll.u32 %s3264_s9, 4  ;;  %s3019_s23 = int_to_ptr.vmem [resolvable:$false] %s3018_s23 }
 0x150   : > { %s3020_s16 = scalar_lea.vmem %s3019_s23, 32  ;;  %p3021_p7 = scmp.lt.s32.totalorder %s602_s5, %s3019_s23 }
 0x151   : > { %p3016_p0 = pnand %p3014_p5, %p3585_p11  ;;  %p3022_p12 = scmp.lt.s32.totalorder %s3020_s16, %s3013_s4 }
 0x153   : > { %p3017_p4 = pneg %p3016_p0  ;;  %p3023_p2 = por %p3022_p12, %p3021_p7 }
 0x155   : > { %p3024_p10 = pnand %p3023_p2, %p3017_p4 }
 0x157   : > { %3027 = shalt.err (!%p3024_p10)
}
 0x158   : > { %p4364_p13 = scmp.ne.s32.totalorder %s4336_s17, 0  ;;  %s2279_s7 = sshll.u32 %s3564_s22, 5 }
 0x159   : > { %s4365_s21 = sld [smem:[#allocation47_spill]]  ;;  %p4367_p5 = scmp.ne.s32.totalorder %s4363_s6, 0 }
 0x15a   : > { %2536 = dma.hbm_to_vmem [thread:$0]  (!%p4364_p13), %s3829_s2, 16, %s602_s5, %s3511_s19  }
 0x15b   : > { %p3030_p12 = pneg %p4367_p5 }
 0x15f   : > { %s4366_s3 = smov %s4365_s21  ;;  %s3028_s0 = scalar_lea.hbm %s4365_s21, 32 }
 0x160   : > { %p3029_p3 = scmp.ne.s32.totalorder %s4366_s3, %s3028_s0  ;;  %p3035_p9 = scmp.lt.u32.totalorder %s3028_s0, %s4366_s3 }
 0x162   : > { %p3031_p7 = pnand %p3030_p12, %p3029_p3 }
 0x164   : > { %p3032_p8 = pneg %p3031_p7 }
 0x166   : > { %p3037_p2 = pnand %p3035_p9, %p3032_p8 }
 0x168   : > { %3040 = shalt.err (!%p3037_p2)
}
 0x169   : > { %s3041_s2 = scalar_lea.vmem %s3821_s30, 32  ;;  %p3049_p4 = scmp.lt.s32.totalorder %s3821_s30, %s3821_s30 }
 0x16a   : > { %p3042_p6 = scmp.ne.s32.totalorder %s3821_s30, %s3041_s2  ;;  %p3050_p10 = scmp.lt.s32.totalorder %s3041_s2, %s3041_s2 }
 0x16c   : > { %p3044_p1 = pnand %p3042_p6, %p3030_p12  ;;  %p3051_p13 = por %p3050_p10, %p3049_p4 }
 0x16e   : > { %p3045_p0 = pneg %p3044_p1 }
 0x170   : > { %p3052_p11 = pnand %p3051_p13, %p3045_p0 }
 0x172   : > { %3055 = shalt.err (!%p3052_p11)
}
 0x173   : > { %2505 = dma.hbm_to_vmem [thread:$0]  (!%p4367_p5), %s4366_s3, 32, %s3821_s30, [#allocation11]  }
 0x174   : > { %s2337_s19 = sshll.u32 %s3240_s29, 9  ;;  %s4368_s16 = sld [smem:[#allocation55_spill]] }
 0x175   : > { %s612_s15 = scalar_lea.vmem [#allocation19], %s2279_s7  ;;  %p4369_p13 = scmp.ne.s32.totalorder %s4342_s20, 0 }
 0x176   : > { %s619_s21 = sshll.u32 %s612_s15, 4  ;;  %s3884_s21 = int_to_ptr.vmem [resolvable:$true] %s619_s21 }
 0x17a   : > { %s3882_s8 = scalar_lea.hbm %s4368_s16, %s2337_s19  ;;  %s3061_s23 = scalar_lea.hbm %s4368_s16, 1024 }
 0x17b   : > { %s3056_s6 = scalar_lea.hbm %s3882_s8, 512  ;;  %p3062_p5 = scmp.lt.u32.totalorder %s3882_s8, %s4368_s16 }
 0x17c   : > { %p3057_p11 = scmp.ne.s32.totalorder %s3882_s8, %s3056_s6  ;;  %p3063_p7 = scmp.lt.u32.totalorder %s3061_s23, %s3056_s6 }
 0x17d   : > { %p3065_p9 = scmp.lt.u32.totalorder %s3056_s6, %s3882_s8 }
 0x17e   : > { %p3059_p3 = pnand %p3057_p11, %p4369_p13  ;;  %p3064_p8 = por %p3063_p7, %p3062_p5 }
 0x180   : > { %p3060_p12 = pneg %p3059_p3  ;;  %p3066_p2 = por %p3065_p9, %p3064_p8 }
 0x182   : > { %p3067_p6 = pnand %p3066_p2, %p3060_p12 }
 0x184   : > { %3070 = shalt.err (!%p3067_p6)
}
 0x185   : > { %s3071_s7 = scalar_lea.vmem %s3884_s21, 512  ;;  %s3265_s5 = smov [#allocation19]  }
 0x186   : > { %p3072_p1 = scmp.ne.s32.totalorder %s3884_s21, %s3071_s7  ;;  %s3076_s0 = sshll.u32 %s3265_s5, 4  ;;  %s3077_s0 = int_to_ptr.vmem [resolvable:$false] %s3076_s0 }
 0x187   : > { %s3078_s19 = scalar_lea.vmem %s3077_s0, 1024  ;;  %p3079_p10 = scmp.lt.s32.totalorder %s3884_s21, %s3077_s0 }
 0x188   : > { %p3074_p0 = pnand %p3072_p1, %p4369_p13  ;;  %p3080_p11 = scmp.lt.s32.totalorder %s3078_s19, %s3071_s7 }
 0x18a   : > { %p3075_p4 = pneg %p3074_p0  ;;  %p3081_p3 = por %p3080_p11, %p3079_p10 }
 0x18c   : > { %p3082_p5 = pnand %p3081_p3, %p3075_p4 }
 0x18e   : > { %3085 = shalt.err (!%p3082_p5)
}
 0x18f   : > { %p4370_p12 = scmp.ne.s32.totalorder %s4336_s17, 0  ;;  %p4371_p13 = scmp.ne.s32.totalorder %s4361_s11, 0 }
 0x190   : > { %s633_s20 = sand.u32 (!%p4371_p13), 1, %s3783_s12   ;;  %s3915_s22 = sand.u32 (!%p4371_p13), 1, %s3224_s25  }
 0x191   : > { %2539 = dma.hbm_to_vmem [thread:$0]  (!%p4370_p12), %s3882_s8, 512, %s3884_s21, %s3457_s26, %s4351_s10, %s4351_s10, %s4350_s28  }
 0x192   : > { %631 = sbr.rel (%p4371_p13) target bundleno = 3362 (0xd22), region = 68  ;;  %s2283_s27 = sshll.u32 (!%p4371_p13), %s3915_s22, 4 }
 0x193   : > { %s3918_s15 = scalar_lea.sflag (!%p4371_p13), [#allocation5], %s633_s20  ;;  %s3920_s17 = scalar_lea.vmem (!%p4371_p13), [#allocation4], %s2283_s27 }
 0x194   : > { %p4372_p7 = scmp.ne.s32.totalorder (!%p4371_p13), %s4355_s1, 0 }
 0x199   : > { %3159 = dma.done.wait (%p4372_p7), %s3918_s15, 256  }
 0x19a   : > { %3161 = vsyncadd (%p4372_p7), %s3918_s15, 4294967040  ;;  %s3928_s26 = scalar_lea.sflag [#allocation8], %s633_s20  ;;  %s645_s28 = scalar_lea.vmem [#allocation7], %s3915_s22 }
 0x19b   : > { %3163 = dma.done.wait (%p4372_p7), %s3928_s26, 272  }
 0x19c   : > { %3165 = vsyncadd (%p4372_p7), %s3928_s26, 4294967024  ;;  %s3937_s10 = scalar_lea.vmem [#allocation9], %s2283_s27  ;;  %p4373_p8 = scmp.eq.s32.totalorder %s3783_s12, 0 }
 0x19e   : > { %3167 = dma.done.wait (%p4373_p8), [#allocation11], 32   ;;  %p4374_p9 = pmov %p4373_p8 }
 0x19f   : > { %s4375_s11 = sld [smem:[#allocation34_spill]]  ;;  %p4376_p2 = scmp.ne.s32.totalorder %s4356_s18, 0 }
 0x1a0   : > { %3169 = vsyncadd (%p4374_p9), [#allocation11], 4294967264 }
 0x1a5   : > { %s3944_s8 = sand.u32 1, %s4375_s11  }
 0x1a6   : > { %s3947_s21 = sshll.u32 %s3944_s8, 4 }
 0x1a7   : > { %s667_s1 = scalar_lea.vmem [#allocation12], %s3947_s21 }
 0x1a8   : > { %3171 = dma.done.wait (%p4376_p2), %s3918_s15, 256  }
 0x1a9   : > { %3173 = vsyncadd (%p4376_p2), %s3918_s15, 4294967040  ;;  %s676_s12 = scalar_lea.vmem [#allocation13], %s3947_s21 }
 0x1aa   : > { %3175 = dma.done.wait (%p4376_p2), %s3928_s26, 256  }
 0x1ab   : > { %3177 = vsyncadd (%p4376_p2), %s3928_s26, 4294967040  ;;  %s685_s6 = scalar_lea.vmem [#allocation14], %s3947_s21 }
 0x1ac   : > { %3179 = dma.done.wait (%p4376_p2), %s3918_s15, 256  }
 0x1ad   : > { %3181 = vsyncadd (%p4376_p2), %s3918_s15, 4294967040  ;;  %s694_s30 = scalar_lea.vmem [#allocation15], %s3947_s21 }
 0x1ae   : > { %3183 = dma.done.wait (%p4376_p2), %s3928_s26, 256  }
 0x1af   : > { %3185 = vsyncadd (%p4376_p2), %s3928_s26, 4294967040  ;;  %s703_s9 = scalar_lea.vmem [#allocation16], %s3947_s21 }
 0x1b0   : > { %3187 = dma.done.wait (%p4376_p2), %s3918_s15, 256  }
 0x1b1   : > { %3189 = vsyncadd (%p4376_p2), %s3918_s15, 4294967040  ;;  %s712_s23 = scalar_lea.vmem [#allocation17], %s3947_s21 }
 0x1b2   : > { %3191 = dma.done.wait (%p4376_p2), %s3928_s26, 256  }
 0x1b3   : > { %3193 = vsyncadd (%p4376_p2), %s3928_s26, 4294967040  ;;  %s720_s4 = scalar_lea.vmem [#allocation18], %s3944_s8 }
 0x1b4   : > { %3195 = dma.done.wait (%p4376_p2), %s3918_s15, 16  }
 0x1b5   : > { %3197 = vsyncadd (%p4376_p2), %s3918_s15, 4294967280  ;;  %s2292_s2 = sshll.u32 %s3944_s8, 5 }
 0x1b6   : > { %s3999_s7 = scalar_lea.vmem [#allocation19], %s2292_s2 }
 0x1b7   : > { %3199 = dma.done.wait (%p4376_p2), %s3928_s26, 512  }
 0x1b8   : > { %3201 = vsyncadd (%p4376_p2), %s3928_s26, 4294966784  ;;  %s816_s5 = scalar_lea.vmem [#allocation20], %s3915_s22  ;;  %s4377_s0 = sld [smem:[#allocation37_spill]] }
 0x1be   : > { %p2293_p6 = scmp.ne.s32.totalorder %s4377_s0, 0 }
 0x1bf   : > { %v823_v0 = vld [vmem:[%s3920_s17] sm:$0xff] (!%p2293_p6)  ;;  %vm825_vm0 = vcmask (!%p2293_p6), 261120   ;;  %v824_v1 = vld [vmem:[%s3920_s17 + $0x8] sm:$0xff] (!%p2293_p6)  ;;  %v853_v16 = vlaneseq (!%p2293_p6) }
 0x1c0   : > { %821 = sbr.rel (%p2293_p6) target bundleno = 766 (0x2fe), region = 120  ;;  %v826_v2 = vsel (!%p2293_p6), %vm825_vm0, %v823_v0, 0.0  ;;  %v829_v3 = vsel (!%p2293_p6), %vm825_vm0, %v824_v1, 0.0  ;;  %v822_v23 = vld [vmem:[#allocation10] sm:$0x3] (!%p2293_p6) }
 0x1c1   : > { %827 = vadd.xlane.f32.xlu0 (!%p2293_p6), %v826_v2  ;;  %v854_v20 = vshrl.u32 (!%p2293_p6), %v853_v16, 7 }
 0x1c3   : > { %v855_v22 = vsub.s32 (!%p2293_p6), 0, %v854_v20  ;;  %v861_v24 = vsub.s32 (!%p2293_p6), 1, %v854_v20 }
 0x1c5   : > { %830 = vadd.xlane.f32.xlu0 (!%p2293_p6), %v829_v3  ;;  %v856_v25 = vrot.slane (!%p2293_p6), %v822_v23, %v855_v22  ;;  %v862_v28 = vrot.slane (!%p2293_p6), %v822_v23, %v861_v24 }
 0x24e   : > { %v828_v4 = vpop.xlane.xlu0 %827 }
 0x24f   : > { %v833_v5 = vmul.f32 0.03125, %v828_v4 }
 0x251   : > { %v835_v6 = vsub.f32 %v823_v0, %v833_v5 }
 0x252   : > { %v831_v7 = vpop.xlane.xlu0 %830 }
 0x253   : > { %v834_v8 = vmul.f32 0.03125, %v831_v7  ;;  %v837_v9 = vmul.f32 %v835_v6, %v835_v6 }
 0x255   : > { %v836_v10 = vsub.f32 %v824_v1, %v834_v8  ;;  %v839_v11 = vsel %vm825_vm0, %v837_v9, 0.0 }
 0x256   : > { %840 = vadd.xlane.f32.xlu1 %v839_v11 }
 0x257   : > { %v838_v12 = vmul.f32 %v836_v10, %v836_v10 }
 0x259   : > { %v842_v13 = vsel %vm825_vm0, %v838_v12, 0.0 }
 0x25a   : > { %843 = vadd.xlane.f32.xlu1 %v842_v13 }
 0x2e3   : > { %v841_v14 = vpop.xlane.xlu1 %840 }
 0x2e4   : > { %v845_v15 = vmul.f32 0.03125, %v841_v14 }
 0x2e6   : > { %v847_v17 = vadd.f32 1e-12, %v845_v15 }
 0x2e7   : > { %v844_v18 = vpop.xlane.xlu1 %843 }
 0x2e8   : > { %2650 = vrsqrt.f32 %v847_v17  ;;  %v846_v19 = vmul.f32 0.03125, %v844_v18 }
 0x2ea   : > { %v848_v21 = vadd.f32 1e-12, %v846_v19 }
 0x2ec   : > { %2652 = vrsqrt.f32 %v848_v21 }
 0x2f2   : > { %v2651_v26 = vpop.eup %2650 }
 0x2f3   : > { %v851_v27 = vmul.f32 %v2651_v26, %v835_v6 }
 0x2f5   : > { %v857_v29 = vmul.f32 %v856_v25, %v851_v27 }
 0x2f6   : > { %v2653_v30 = vpop.eup %2652 }
 0x2f7   : > { %v863_v31 = vadd.f32 %v862_v28, %v857_v29  ;;  %v852_v32 = vmul.f32 %v2653_v30, %v836_v10 }
 0x2f9   : > { %865 = vst.msk [vmem:[#allocation2] sm:$0xff] %vm825_vm0, %v863_v31  ;;  %867 = vst.msk [vmem:[#allocation3] sm:$0xff] %vm825_vm0, %v863_v31  ;;  %v858_v33 = vmul.f32 %v856_v25, %v852_v32 }
 0x2fb   : > { %v864_v34 = vadd.f32 %v862_v28, %v858_v33 }
 0x2fd   : > { %866 = vst.msk [vmem:[#allocation2 + $0x8] sm:$0xff] %vm825_vm0, %v864_v34  ;;  %868 = vst.msk [vmem:[#allocation3 + $0x8] sm:$0xff] %vm825_vm0, %v864_v34 }
 0x2fe PF: > { %v2669_v35 = vld [vmem:[%s676_s12] sm:$0xff]   ;;  %v3266_v36 = vmov 0.0   ;;  %v2671_v38 = vld [vmem:[%s676_s12 + $0x8] sm:$0xff]   ;;  %vm3267_vm1 = vmmov 0   ;;  %vm894_vm2 = vcmask 261120   ;;  %v878_v43 = vlaneseq  ;;  %s3268_s18 = smov 112  }
 0x2ff   : > { %2382 = vmatprep.subr.bf16.mxu1 %v3266_v36  ;;  %2374 = vmatprep.subr.bf16.mxu0 %v3266_v36  ;;  %v2670_v37 = vld [vmem:[%s667_s1] sm:$0xff]   ;;  %v2672_v41 = vld [vmem:[%s667_s1 + $0x8] sm:$0xff]   ;;  %vm1065_vm3 = vcmask 64512   ;;  %s3269_s19 = smov 120   ;;  %s3270_s20 = smov 104   ;;  %vm1123_vm4 = vcmask 130048  }
 0x300   : > { %2383 = vmatpush3.bf16.msra.mxu1 %v2669_v35  ;;  %2386 = vmatprep.mubr.msk.bf16.mxu1 %vm3267_vm1, %v3266_v36  ;;  %v4030_v39 = vld [vmem:[#allocation3] sm:$0xff]  ;;  %v4049_v44 = vshrl.u32 %v878_v43, 7  ;;  %v2304_v13 = vld [vmem:[%s645_s28] ss:$0 sm:$0xff]  ;;  %s3271_s27 = smov 8   ;;  %s3272_s15 = smov 16  }
 0x301   : > { %2384 = vmatprep.subr.bf16.mxu1 %v3266_v36  ;;  %2375 = vmatpush3.bf16.msra.mxu0 %v2670_v37  ;;  %v4055_v47 = vld [vmem:[%s703_s9] sm:$0xff]  ;;  %v2674_v2 = vld [vmem:[%s685_s6 + $0x8] sm:$0xff]   ;;  %s3273_s17 = smov 24   ;;  %vm1597_vm5 = vcmask 195584   ;;  %vm1829_vm6 = vcmask 523264   ;;  %s4378_s26 = sld [smem:[#allocation37_spill]] }
 0x302   : > { %2376 = vmatprep.subr.bf16.mxu0 %v3266_v36  ;;  %2378 = vmatprep.mubr.msk.bf16.mxu0 %vm3267_vm1, %v3266_v36  ;;  %v880_v45 = vsub.s32 0, %v4049_v44  ;;  %v945_v46 = vsub.s32 1, %v4049_v44  ;;  %v2673_v1 = vld [vmem:[%s685_s6] sm:$0xff]   ;;  %v1006_v23 = vsub.s32 2, %v4049_v44 }
 0x304   : > { %v4032_v40 = vld [vmem:[#allocation3 + $0x8] sm:$0xff]  ;;  %2385 = vmatpush3.bf16.msra.mxu1 %v2671_v38  ;;  %v881_v48 = vrot.slane %v4055_v47, %v880_v45  ;;  %v946_v49 = vrot.slane %v4055_v47, %v945_v46  ;;  %v1007_v24 = vrot.slane %v4055_v47, %v1006_v23 }
 0x305   : > { %v871_v42 = vpack.c.bf16 %v4032_v40, %v4030_v39  ;;  %2377 = vmatpush3.bf16.msra.mxu0 %v2672_v41  ;;  %2398 = vmatprep.subr.bf16.mxu1 %v3266_v36 }
 0x306   : > { %2390 = vmatprep.subr.bf16.mxu0 %v3266_v36 }
 0x307   : > { %2387 = vmatmul.mubr.msk.bf16.vlgmr.msra.gmra.mrb[0].mxu1 %vm894_vm2, %v871_v42  ;;  %p2325_p1 = scmp.ne.s32.totalorder %s4378_s26, 1 }
 0x308   : > { %2379 = vmatmul.mubr.msk.bf16.vlgmr.msra.gmra.mrb[0].mxu0 %vm894_vm2, %v871_v42  ;;  %2400 = vmatprep.mubr.msk.bf16.mxu1 %vm3267_vm1, %v3266_v36  ;;  %vm1949_vm7 = vcmask (!%p2325_p1), 253952  }
 0x309   : > { %2394 = vmatprep.mubr.msk.bf16.mxu0 %vm3267_vm1, %v3266_v36  ;;  %2391 = vmatpush3.bf16.msra.mxu0 %v2673_v1 }
 0x30a   : > { %2392 = vmatprep.subr.bf16.mxu0 %v3266_v36 }
 0x30d   : > { %2393 = vmatpush3.bf16.msra.mxu0 %v2674_v2 }
 0x30e   : > { %2404 = vmatprep.subr.bf16.mxu0 %v3266_v36 }
 0x310   : > { %2395 = vmatmul.mubr.msk.bf16.vlgmr.msra.gmra.mrb[4].mxu0 %vm894_vm2, %v871_v42 }
 0x311   : > { %2406 = vmatprep.mubr.msk.bf16.mxu0 %vm3267_vm1, %v3266_v36 }
 0x3da   : > { %v993_v50 = vpop.f32.mrb[0].mxu1 }
 0x3db   : > { %v2388_v51 = vpop.f32.mrb[1].mxu1  ;;  %v932_v52 = vpop.f32.mrb[0].mxu0  ;;  %v994_v56 = vadd.f32 %v993_v50, %v946_v49 }
 0x3dc   : > { %v996_v53 = vpop.f32.mrb[2].mxu1  ;;  %v933_v54 = vadd.f32 %v932_v52, %v881_v48  ;;  %v2380_v55 = vpop.f32.mrb[1].mxu0 }
 0x3dd   : > { %v997_v57 = vadd.f32 %v996_v53, %v946_v49  ;;  %v2389_v58 = vpop.f32.mrb[3].mxu1  ;;  %v935_v59 = vpop.f32.mrb[2].mxu0 }
 0x3de   : > { %v936_v60 = vadd.f32 %v935_v59, %v881_v48  ;;  %v2381_v61 = vpop.f32.mrb[3].mxu0 }
 0x3df   : > { %v1063_v62 = vpack.c.bf16 %v997_v57, %v994_v56 }
 0x3e0   : > { %v1062_v63 = vpack.c.bf16 %v936_v60, %v933_v54 }
 0x3e1   : > { %1321 = vrot.lane.b32.xlu1 %v1063_v62, %s3268_s18  ;;  %1195 = vrot.lane.b32.xlu0 %v1063_v62, %s3269_s19  ;;  %v1070_v0 = vsel %vm1065_vm3, %v1063_v62, 0 }
 0x3e2   : > { %2399 = vmatpush3.bf16.xpose.msra.mxu1 %v1070_v0 }
 0x3e3   : > { %2410 = vmatprep.subr.bf16.mxu1 %v3266_v36  ;;  %v1054_v25 = vpop.f32.mrb[4].mxu0 }
 0x3e4   : > { %v1055_v26 = vadd.f32 %v1054_v25, %v1007_v24  ;;  %v2396_v27 = vpop.f32.mrb[5].mxu0 }
 0x3e5   : > { %1319 = vrot.lane.b32.xlu1 %v1062_v63, %s3268_s18  ;;  %1192 = vrot.lane.b32.xlu0 %v1062_v63, %s3269_s19  ;;  %v1057_v28 = vpop.f32.mrb[6].mxu0 }
 0x3e6   : > { %v1058_v29 = vadd.f32 %v1057_v28, %v1007_v24  ;;  %v2397_v30 = vpop.f32.mrb[7].mxu0 }
 0x3e8   : > { %v4100_v31 = vpack.c.bf16 %v1058_v29, %v1055_v26 }
 0x3e9   : > { %1444 = vrot.lane.b32.xlu1 %v1062_v63, %s3270_s20  ;;  %1446 = vrot.lane.b32.xlu0 %v1063_v62, %s3270_s20 }
 0x3ea   : > { %2401 = vmatmul.mubr.msk.bf16.vlgmr.msra.gmra.mrb[4].mxu1 %vm1065_vm3, %v1062_v63  ;;  %2405 = vmatpush3.bf16.msra.mxu0 %v4100_v31 }
 0x3eb   : > { %2412 = vmatprep.mubr.msk.bf16.mxu1 %vm3267_vm1, %v3266_v36  ;;  %2416 = vmatprep.subr.bf16.mxu0 %v3266_v36 }
 0x453   : > { %v1196_v3 = vpop.permute.xlu0 %1195  ;;  %v1322_v5 = vpop.permute.xlu1 %1321 }
 0x454   : > { %v1201_v4 = vsel %vm1065_vm3, %v1196_v3, 0  ;;  %v1327_v7 = vsel %vm1065_vm3, %v1322_v5, 0 }
 0x455   : > { %2411 = vmatpush3.bf16.xpose.msra.mxu1 %v1201_v4 }
 0x456   : > { %2422 = vmatprep.subr.bf16.mxu1 %v3266_v36 }
 0x457   : > { %v1193_v6 = vpop.permute.xlu0 %1192  ;;  %v1320_v9 = vpop.permute.xlu1 %1319 }
 0x45b   : > { %v1447_v8 = vpop.permute.xlu0 %1446  ;;  %v1445_v11 = vpop.permute.xlu1 %1444 }
 0x45c   : > { %2413 = vmatmul.mubr.msk.bf16.vlgmr.msra.gmra.mrb[8].mxu1 %vm1065_vm3, %v1193_v6  ;;  %v1452_v10 = vsel %vm1065_vm3, %v1447_v8, 0 }
 0x45d   : > { %2423 = vmatpush3.bf16.xpose.msra.mxu1 %v1327_v7  ;;  %2424 = vmatprep.mubr.msk.bf16.mxu1 %vm3267_vm1, %v3266_v36 }
 0x45e   : > { %2434 = vmatprep.subr.bf16.mxu1 %v3266_v36 }
 0x464   : > { %2425 = vmatmul.mubr.msk.bf16.vlgmr.msra.gmra.mrb[12].mxu1 %vm1065_vm3, %v1320_v9 }
 0x465   : > { %2435 = vmatpush3.bf16.xpose.msra.mxu1 %v1452_v10  ;;  %2436 = vmatprep.mubr.msk.bf16.mxu1 %vm3267_vm1, %v3266_v36 }
 0x466   : > { %2446 = vmatprep.subr.bf16.mxu1 %v3266_v36 }
 0x46c   : > { %2437 = vmatmul.mubr.msk.bf16.vlgmr.msra.gmra.mrb[16].mxu1 %vm1065_vm3, %v1445_v11 }
 0x46d   : > { %2450 = vmatprep.mubr.msk.bf16.mxu1 %vm3267_vm1, %v3266_v36 }
 0x4bd   : > { %v1106_v12 = vpop.f32.mrb[4].mxu1 }
 0x4be   : > { %v1113_v14 = vmul.f32 0.35355338, %v1106_v12  ;;  %v2402_v15 = vpop.f32.mrb[5].mxu1 }
 0x4bf   : > { %v1109_v16 = vpop.f32.mrb[6].mxu1 }
 0x4c0   : > { %v1114_v17 = vmul.f32 0.35355338, %v1109_v16  ;;  %v2403_v18 = vpop.f32.mrb[7].mxu1  ;;  %v1121_v19 = vadd.f32 %v2304_v13, %v1113_v14 }
 0x4c2   : > { %v1124_v20 = vsel %vm1123_vm4, %v1121_v19, -inf  ;;  %v1122_v21 = vadd.f32 %v2304_v13, %v1114_v17 }
 0x4c3   : > { %1125 = vmax.xlane.f32.xlu0 %v1124_v20 }
 0x4c4   : > { %v1127_v22 = vsel %vm1123_vm4, %v1122_v21, -inf }
 0x4c5   : > { %1128 = vmax.xlane.f32.xlu1 %v1127_v22 }
 0x52f   : > { %v1237_v32 = vpop.f32.mrb[8].mxu1 }
 0x530   : > { %v1244_v33 = vmul.f32 0.35355338, %v1237_v32  ;;  %v2414_v34 = vpop.f32.mrb[9].mxu1 }
 0x531   : > { %v1240_v35 = vpop.f32.mrb[10].mxu1 }
 0x532   : > { %v1245_v37 = vmul.f32 0.35355338, %v1240_v35  ;;  %v2415_v38 = vpop.f32.mrb[11].mxu1  ;;  %v1246_v41 = vadd.f32 %v2304_v13, %v1244_v33 }
 0x534   : > { %v1248_v42 = vsel %vm1123_vm4, %v1246_v41, -inf  ;;  %v1247_v43 = vadd.f32 %v2304_v13, %v1245_v37 }
 0x535   : > { %1249 = vmax.xlane.f32.xlu0 %v1248_v42 }
 0x536   : > { %v1251_v49 = vsel %vm1123_vm4, %v1247_v43, -inf }
 0x537   : > { %v1363_v45 = vpop.f32.mrb[12].mxu1 }
 0x538   : > { %v1370_v46 = vmul.f32 0.35355338, %v1363_v45  ;;  %v2426_v48 = vpop.f32.mrb[13].mxu1 }
 0x539   : > { %1252 = vmax.xlane.f32.xlu0 %v1251_v49  ;;  %v1366_v50 = vpop.f32.mrb[14].mxu1 }
 0x53a   : > { %v1371_v51 = vmul.f32 0.35355338, %v1366_v50  ;;  %v2427_v52 = vpop.f32.mrb[15].mxu1  ;;  %v1372_v53 = vadd.f32 %v2304_v13, %v1370_v46 }
 0x53c   : > { %v1374_v54 = vsel %vm1123_vm4, %v1372_v53, -inf  ;;  %v1373_v55 = vadd.f32 %v2304_v13, %v1371_v51 }
 0x53d   : > { %1375 = vmax.xlane.f32.xlu1 %v1374_v54 }
 0x53e   : > { %v1377_v56 = vsel %vm1123_vm4, %v1373_v55, -inf }
 0x53f   : > { %1378 = vmax.xlane.f32.xlu0 %v1377_v56  ;;  %v1488_v57 = vpop.f32.mrb[16].mxu1 }
 0x540   : > { %v1495_v58 = vmul.f32 0.35355338, %v1488_v57  ;;  %v2438_v59 = vpop.f32.mrb[17].mxu1 }
 0x541   : > { %v1491_v60 = vpop.f32.mrb[18].mxu1 }
 0x542   : > { %v1496_v61 = vmul.f32 0.35355338, %v1491_v60  ;;  %v2439_v62 = vpop.f32.mrb[19].mxu1  ;;  %v1497_v63 = vadd.f32 %v2304_v13, %v1495_v58 }
 0x544   : > { %v1499_v0 = vsel %vm1123_vm4, %v1497_v63, -inf  ;;  %v1498_v1 = vadd.f32 %v2304_v13, %v1496_v61 }
 0x545   : > { %1500 = vmax.xlane.f32.xlu1 %v1499_v0 }
 0x546   : > { %v1502_v2 = vsel %vm1123_vm4, %v1498_v1, -inf }
 0x547   : > { %1503 = vmax.xlane.f32.xlu0 %v1502_v2 }
 0x550   : > { %v1126_v3 = vpop.xlane.xlu0 %1125 }
 0x551   : > { %v1130_v4 = vsub.f32 %v1121_v19, %v1126_v3 }
 0x552   : > { %v1129_v5 = vpop.xlane.xlu1 %1128 }
 0x553   : > { %v1132_v6 = vmul.f32 1.442695, %v1130_v4  ;;  %v1131_v7 = vsub.f32 %v1122_v21, %v1129_v5 }
 0x555   : > { %2683 = vpow2.f32 %v1132_v6  ;;  %v1134_v8 = vmul.f32 1.442695, %v1131_v7 }
 0x557   : > { %2685 = vpow2.f32 %v1134_v8 }
 0x55f   : > { %v2684_v9 = vpop.eup %2683 }
 0x560   : > { %v1136_v10 = vsel %vm1123_vm4, %v2684_v9, 0.0 }
 0x561   : > { %v2686_v11 = vpop.eup %2685  ;;  %1137 = vadd.xlane.f32.xlu1 %v1136_v10 }
 0x562   : > { %v1139_v12 = vsel %vm1123_vm4, %v2686_v11, 0.0 }
 0x563   : > { %1140 = vadd.xlane.f32.xlu0 %v1139_v12 }
 0x572   : > { %1272 = vrot.lane.b32.xlu1 %v4100_v31, %s3269_s19 }
 0x5c2   : > { %v1250_v13 = vpop.xlane.xlu0 %1249 }
 0x5c3   : > { %v1254_v14 = vsub.f32 %v1246_v41, %v1250_v13 }
 0x5c5   : > { %v1256_v15 = vmul.f32 1.442695, %v1254_v14 }
 0x5c6   : > { %v1253_v16 = vpop.xlane.xlu0 %1252 }
 0x5c7   : > { %2687 = vpow2.f32 %v1256_v15  ;;  %v1255_v17 = vsub.f32 %v1247_v43, %v1253_v16 }
 0x5c9   : > { %v1258_v18 = vmul.f32 1.442695, %v1255_v17 }
 0x5ca   : > { %v1376_v19 = vpop.xlane.xlu1 %1375 }
 0x5cb   : > { %2689 = vpow2.f32 %v1258_v18  ;;  %v1380_v20 = vsub.f32 %v1372_v53, %v1376_v19 }
 0x5cc   : > { %v1379_v21 = vpop.xlane.xlu0 %1378 }
 0x5cd   : > { %v1382_v22 = vmul.f32 1.442695, %v1380_v20  ;;  %v1381_v23 = vsub.f32 %v1373_v55, %v1379_v21 }
 0x5cf   : > { %2691 = vpow2.f32 %v1382_v22  ;;  %v1384_v24 = vmul.f32 1.442695, %v1381_v23  ;;  %v2675_v22 = vld [vmem:[%s694_s30] sm:$0xff]  }
 0x5d0   : > { %2447 = vmatpush3.bf16.msra.mxu1 %v2675_v22 }
 0x5d1   : > { %v2688_v25 = vpop.eup %2687  ;;  %2693 = vpow2.f32 %v1384_v24  ;;  %2448 = vmatprep.subr.bf16.mxu1 %v3266_v36 }
 0x5d2   : > { %v1501_v26 = vpop.xlane.xlu1 %1500  ;;  %v1260_v27 = vsel %vm1123_vm4, %v2688_v25, 0.0 }
 0x5d3   : > { %v1505_v28 = vsub.f32 %v1497_v63, %v1501_v26  ;;  %1261 = vadd.xlane.f32.xlu1 %v1260_v27  ;;  %v2676_v27 = vld [vmem:[%s694_s30 + $0x8] sm:$0xff]  }
 0x5d4   : > { %v1504_v29 = vpop.xlane.xlu0 %1503  ;;  %2449 = vmatpush3.bf16.msra.mxu1 %v2676_v27 }
 0x5d5   : > { %v2690_v30 = vpop.eup %2689  ;;  %v1507_v32 = vmul.f32 1.442695, %v1505_v28  ;;  %v1506_v33 = vsub.f32 %v1498_v1, %v1504_v29  ;;  %2462 = vmatprep.subr.bf16.mxu1 %v3266_v36 }
 0x5d6   : > { %v1263_v34 = vsel %vm1123_vm4, %v2690_v30, 0.0 }
 0x5d7   : > { %2695 = vpow2.f32 %v1507_v32  ;;  %v1509_v35 = vmul.f32 1.442695, %v1506_v33  ;;  %1264 = vadd.xlane.f32.xlu0 %v1263_v34 }
 0x5d9   : > { %v2692_v37 = vpop.eup %2691  ;;  %2697 = vpow2.f32 %v1509_v35 }
 0x5da   : > { %v1386_v38 = vsel %vm1123_vm4, %v2692_v37, 0.0 }
 0x5db   : > { %v2694_v41 = vpop.eup %2693  ;;  %1387 = vadd.xlane.f32.xlu1 %v1386_v38 }
 0x5dc   : > { %v1389_v42 = vsel %vm1123_vm4, %v2694_v41, 0.0 }
 0x5dd   : > { %1390 = vadd.xlane.f32.xlu0 %v1389_v42 }
 0x5e1   : > { %v2696_v43 = vpop.eup %2695 }
 0x5e2   : > { %v1511_v45 = vsel %vm1123_vm4, %v2696_v43, 0.0 }
 0x5e3   : > { %v2698_v46 = vpop.eup %2697  ;;  %1512 = vadd.xlane.f32.xlu1 %v1511_v45 }
 0x5e4   : > { %v1514_v48 = vsel %vm1123_vm4, %v2698_v46, 0.0 }
 0x5e5   : > { %1515 = vadd.xlane.f32.xlu0 %v1514_v48 }
 0x5ee   : > { %v1138_v49 = vpop.xlane.xlu1 %1137 }
 0x5ef   : > { %2699 = vrcp.f32 %v1138_v49 }
 0x5f0   : > { %v1141_v50 = vpop.xlane.xlu0 %1140 }
 0x5f1   : > { %2701 = vrcp.f32 %v1141_v50 }
 0x5f2   : > { %v1273_v56 = vpop.permute.xlu1 %1272 }
 0x5f4   : > { %1522 = vrot.lane.b32.xlu1 %v4100_v31, %s3270_s20 }
 0x5f9   : > { %v2700_v51 = vpop.eup %2699 }
 0x5fa   : > { %v1144_v53 = vmul.f32 %v2700_v51, %v2684_v9 }
 0x5fb   : > { %v2702_v52 = vpop.eup %2701  ;;  %1397 = vrot.lane.b32.xlu0 %v4100_v31, %s3268_s18 }
 0x5fc   : > { %v1145_v54 = vmul.f32 %v2702_v52, %v2686_v11 }
 0x5fe   : > { %v1146_v55 = vpack.c.bf16 %v1145_v54, %v1144_v53 }
 0x600   : > { %2407 = vmatmul.mubr.msk.bf16.vlgmr.msra.gmra.mrb[8].mxu0 %vm1123_vm4, %v1146_v55 }
 0x601   : > { %2417 = vmatpush3.bf16.msra.mxu0 %v1273_v56  ;;  %2418 = vmatprep.mubr.msk.bf16.mxu0 %vm3267_vm1, %v3266_v36 }
 0x602   : > { %2428 = vmatprep.subr.bf16.mxu0 %v3266_v36 }
 0x660   : > { %v1262_v57 = vpop.xlane.xlu1 %1261 }
 0x661   : > { %2703 = vrcp.f32 %v1262_v57 }
 0x664   : > { %v1265_v58 = vpop.xlane.xlu0 %1264 }
 0x665   : > { %2705 = vrcp.f32 %v1265_v58  ;;  %v1607_v58 = vsub.s32 3, %v4049_v44 }
 0x668   : > { %v1388_v59 = vpop.xlane.xlu1 %1387 }
 0x669   : > { %2707 = vrcp.f32 %v1388_v59  ;;  %v1608_v59 = vrot.slane %v4055_v47, %v1607_v58 }
 0x66a   : > { %v1391_v60 = vpop.xlane.xlu0 %1390 }
 0x66b   : > { %2709 = vrcp.f32 %v1391_v60  ;;  %v2704_v31 = vpop.eup %2703 }
 0x66c   : > { %v1268_v62 = vmul.f32 %v2704_v31, %v2688_v25 }
 0x66f   : > { %v2706_v61 = vpop.eup %2705 }
 0x670   : > { %v1269_v63 = vmul.f32 %v2706_v61, %v2690_v30  ;;  %v1513_v0 = vpop.xlane.xlu1 %1512 }
 0x671   : > { %2711 = vrcp.f32 %v1513_v0 }
 0x672   : > { %v1516_v1 = vpop.xlane.xlu0 %1515  ;;  %v1270_v2 = vpack.c.bf16 %v1269_v63, %v1268_v62 }
 0x673   : > { %2713 = vrcp.f32 %v1516_v1  ;;  %v2708_v3 = vpop.eup %2707 }
 0x674   : > { %2419 = vmatmul.mubr.msk.bf16.vlgmr.msra.gmra.mrb[12].mxu0 %vm1123_vm4, %v1270_v2  ;;  %v1394_v7 = vmul.f32 %v2708_v3, %v2692_v37  ;;  %v1523_v10 = vpop.permute.xlu1 %1522 }
 0x675   : > { %v2710_v4 = vpop.eup %2709  ;;  %2430 = vmatprep.mubr.msk.bf16.mxu0 %vm3267_vm1, %v3266_v36 }
 0x676   : > { %v1395_v5 = vmul.f32 %v2710_v4, %v2694_v41  ;;  %v1398_v6 = vpop.permute.xlu0 %1397 }
 0x677   : > { %2429 = vmatpush3.bf16.msra.mxu0 %v1398_v6 }
 0x678   : > { %2440 = vmatprep.subr.bf16.mxu0 %v3266_v36  ;;  %v1396_v8 = vpack.c.bf16 %v1395_v5, %v1394_v7 }
 0x67b   : > { %v2712_v9 = vpop.eup %2711 }
 0x67c   : > { %2431 = vmatmul.mubr.msk.bf16.vlgmr.msra.gmra.mrb[16].mxu0 %vm1123_vm4, %v1396_v8  ;;  %v1519_v13 = vmul.f32 %v2712_v9, %v2696_v43 }
 0x67d   : > { %v2714_v11 = vpop.eup %2713  ;;  %2441 = vmatpush3.bf16.msra.mxu0 %v1523_v10  ;;  %2442 = vmatprep.mubr.msk.bf16.mxu0 %vm3267_vm1, %v3266_v36 }
 0x67e   : > { %v1520_v12 = vmul.f32 %v2714_v11, %v2698_v46  ;;  %2454 = vmatprep.subr.bf16.mxu0 %v3266_v36 }
 0x680   : > { %v1521_v14 = vpack.c.bf16 %v1520_v12, %v1519_v13 }
 0x684   : > { %2443 = vmatmul.mubr.msk.bf16.vlgmr.msra.gmra.mrb[20].mxu0 %vm1123_vm4, %v1521_v14  ;;  %v2678_v14 = vld [vmem:[%s712_s23 + $0x8] sm:$0xff]  }
 0x685   : > { %2458 = vmatprep.mubr.msk.bf16.mxu0 %vm3267_vm1, %v3266_v36 }
 0x6d3   : > { %v1184_v15 = vpop.f32.mrb[8].mxu0 }
 0x6d4   : > { %v2408_v16 = vpop.f32.mrb[9].mxu0 }
 0x6d5   : > { %v1187_v17 = vpop.f32.mrb[10].mxu0 }
 0x6d6   : > { %v2409_v18 = vpop.f32.mrb[11].mxu0 }
 0x747   : > { %v1312_v19 = vpop.f32.mrb[12].mxu0 }
 0x748   : > { %v2420_v20 = vpop.f32.mrb[13].mxu0 }
 0x749   : > { %v1315_v21 = vpop.f32.mrb[14].mxu0 }
 0x74a   : > { %v2654_v23 = vpack.i.bf16 %v1315_v21, %v1312_v19  ;;  %v2421_v24 = vpop.f32.mrb[15].mxu0  ;;  %v1696_v21 = vsub.s32 4, %v4049_v44 }
 0x74c   : > { %2655 = vrot.lane.b32.xlu1 %v2654_v23, %s3271_s27  ;;  %v1697_v23 = vrot.slane %v4055_v47, %v1696_v21 }
 0x74f   : > { %v1437_v25 = vpop.f32.mrb[16].mxu0 }
 0x750   : > { %v2432_v26 = vpop.f32.mrb[17].mxu0 }
 0x751   : > { %v1440_v28 = vpop.f32.mrb[18].mxu0 }
 0x752   : > { %v2659_v29 = vpack.i.bf16 %v1440_v28, %v1437_v25  ;;  %v2433_v30 = vpop.f32.mrb[19].mxu0  ;;  %v1702_v25 = vsub.s32 5, %v4049_v44 }
 0x754   : > { %2660 = vrot.lane.b32.xlu0 %v2659_v29, %s3272_s15  ;;  %v1703_v29 = vrot.slane %v4055_v47, %v1702_v25 }
 0x757   : > { %v1562_v32 = vpop.f32.mrb[20].mxu0 }
 0x758   : > { %v2444_v33 = vpop.f32.mrb[21].mxu0 }
 0x759   : > { %v1565_v34 = vpop.f32.mrb[22].mxu0 }
 0x75a   : > { %v2664_v35 = vpack.i.bf16 %v1565_v34, %v1562_v32  ;;  %v2445_v37 = vpop.f32.mrb[23].mxu0 }
 0x75b   : > { %v2680_v37 = vld [vmem:[%s3999_s7 + $0x8] sm:$0xff]  }
 0x75c   : > { %2665 = vrot.lane.b32.xlu1 %v2664_v35, %s3273_s17  ;;  %v2679_v35 = vld [vmem:[%s3999_s7] sm:$0xff]  }
 0x7be   : > { %v2656_v38 = vpop.permute.xlu1 %2655 }
 0x7bf   : > { %v2658_v42 = vunpack.i.h.bf16 %v2656_v38  ;;  %v2657_v43 = vunpack.i.l.bf16 %v2656_v38  ;;  %v2681_v38 = vld [vmem:[%s3999_s7 + $0x10] sm:$0xff]  }
 0x7c1   : > { %v1594_v49 = vsel %vm1065_vm3, %v1187_v17, %v2658_v42  ;;  %v1593_v50 = vsel %vm1065_vm3, %v1184_v15, %v2657_v43  ;;  %v2315_v42 = vld [vmem:[%s720_s4] ss:$0 sm:$0xff] }
 0x7c6   : > { %v2661_v41 = vpop.permute.xlu0 %2660 }
 0x7c7   : > { %v2663_v45 = vunpack.i.h.bf16 %v2661_v41  ;;  %v2662_v46 = vunpack.i.l.bf16 %v2661_v41  ;;  %v2682_v41 = vld [vmem:[%s3999_s7 + $0x18] sm:$0xff]  }
 0x7c9   : > { %v1596_v53 = vsel %vm1123_vm4, %v1594_v49, %v2663_v45  ;;  %v1595_v54 = vsel %vm1123_vm4, %v1593_v50, %v2662_v46 }
 0x7ce   : > { %v2666_v48 = vpop.permute.xlu1 %2665 }
 0x7cf   : > { %v2668_v51 = vunpack.i.h.bf16 %v2666_v48  ;;  %v2667_v52 = vunpack.i.l.bf16 %v2666_v48 }
 0x7d1   : > { %v1599_v55 = vsel %vm1597_vm5, %v1596_v53, %v2668_v51  ;;  %v1598_v56 = vsel %vm1597_vm5, %v1595_v54, %v2667_v52 }
 0x7d2   : > { %v1600_v57 = vpack.c.bf16 %v1599_v55, %v1598_v56 }
 0x7d4   : > { %2451 = vmatmul.mubr.msk.bf16.vlgmr.msra.gmra.mrb[20].mxu1 %vm894_vm2, %v1600_v57 }
 0x7d5   : > { %2470 = vmatprep.mubr.msk.bf16.mxu1 %vm3267_vm1, %v3266_v36  ;;  %2463 = vmatpush3.bf16.msra.mxu1 %v2679_v35 }
 0x7d6   : > { %2464 = vmatprep.subr.bf16.mxu1 %v3266_v36 }
 0x7d9   : > { %2465 = vmatpush3.bf16.msra.mxu1 %v2680_v37  ;;  %v2324_v37 = vld [vmem:[%s703_s9 + $0x8] ss:$0 sm:$0xff] }
 0x7da   : > { %2466 = vmatprep.subr.bf16.mxu1 %v3266_v36 }
 0x7dd   : > { %2467 = vmatpush3.bf16.msra.mxu1 %v2681_v38 }
 0x7de   : > { %2468 = vmatprep.subr.bf16.mxu1 %v3266_v36 }
 0x7e1   : > { %2469 = vmatpush3.bf16.msra.mxu1 %v2682_v41 }
 0x8a7   : > { %v1658_v60 = vpop.f32.mrb[20].mxu1 }
 0x8a8   : > { %v1659_v31 = vadd.f32 %v1658_v60, %v1608_v59  ;;  %v2452_v61 = vpop.f32.mrb[21].mxu1 }
 0x8a9   : > { %v1661_v62 = vpop.f32.mrb[22].mxu1 }
 0x8aa   : > { %v1662_v63 = vadd.f32 %v1661_v62, %v1608_v59  ;;  %v2453_v0 = vpop.f32.mrb[23].mxu1  ;;  %v1665_v1 = vadd.f32 %v1659_v31, %v4030_v39 }
 0x8ac   : > { %v1667_v2 = vsel %vm894_vm2, %v1665_v1, 0.0  ;;  %v1666_v3 = vadd.f32 %v1662_v63, %v4032_v40  ;;  %v2677_v40 = vld [vmem:[%s712_s23] sm:$0xff]  }
 0x8ad   : > { %1668 = vadd.xlane.f32.xlu0 %v1667_v2  ;;  %2455 = vmatpush3.bf16.msra.mxu0 %v2677_v40 }
 0x8ae   : > { %v1670_v4 = vsel %vm894_vm2, %v1666_v3, 0.0  ;;  %2456 = vmatprep.subr.bf16.mxu0 %v3266_v36 }
 0x8af   : > { %1671 = vadd.xlane.f32.xlu1 %v1670_v4  ;;  %v1803_v4 = vsub.s32 6, %v4049_v44 }
 0x8b1   : > { %2457 = vmatpush3.bf16.msra.mxu0 %v2678_v14 }
 0x93a   : > { %v1669_v5 = vpop.xlane.xlu0 %1668 }
 0x93b   : > { %v1674_v6 = vmul.f32 0.03125, %v1669_v5  ;;  %v1804_v5 = vrot.slane %v4055_v47, %v1803_v4 }
 0x93c   : > { %v1672_v7 = vpop.xlane.xlu1 %1671 }
 0x93d   : > { %v1676_v8 = vsub.f32 %v1665_v1, %v1674_v6  ;;  %v1675_v9 = vmul.f32 0.03125, %v1672_v7 }
 0x93f   : > { %v1677_v10 = vsub.f32 %v1666_v3, %v1675_v9  ;;  %v1678_v11 = vmul.f32 %v1676_v8, %v1676_v8 }
 0x941   : > { %v1680_v12 = vsel %vm894_vm2, %v1678_v11, 0.0  ;;  %v1679_v39 = vmul.f32 %v1677_v10, %v1677_v10 }
 0x942   : > { %1681 = vadd.xlane.f32.xlu0 %v1680_v12 }
 0x943   : > { %v1683_v13 = vsel %vm894_vm2, %v1679_v39, 0.0 }
 0x946   : > { %1684 = vadd.xlane.f32.xlu0 %v1683_v13 }
 0x9cf   : > { %v1682_v15 = vpop.xlane.xlu0 %1681 }
 0x9d0   : > { %v1686_v16 = vmul.f32 0.03125, %v1682_v15 }
 0x9d2   : > { %v1688_v17 = vadd.f32 1e-12, %v1686_v16 }
 0x9d3   : > { %v1685_v18 = vpop.xlane.xlu0 %1684 }
 0x9d4   : > { %2715 = vrsqrt.f32 %v1688_v17  ;;  %v1687_v19 = vmul.f32 0.03125, %v1685_v18 }
 0x9d6   : > { %v1689_v20 = vadd.f32 1e-12, %v1687_v19 }
 0x9d8   : > { %2717 = vrsqrt.f32 %v1689_v20 }
 0x9de   : > { %v2716_v22 = vpop.eup %2715 }
 0x9df   : > { %v1692_v24 = vmul.f32 %v2716_v22, %v1676_v8 }
 0x9e1   : > { %v1698_v27 = vmul.f32 %v1697_v23, %v1692_v24 }
 0x9e2   : > { %v2718_v26 = vpop.eup %2717 }
 0x9e3   : > { %v1693_v28 = vmul.f32 %v2718_v26, %v1677_v10  ;;  %v1704_v32 = vadd.f32 %v1703_v29, %v1698_v27 }
 0x9e5   : > { %v1699_v30 = vmul.f32 %v1697_v23, %v1693_v28 }
 0x9e7   : > { %v1705_v33 = vadd.f32 %v1703_v29, %v1699_v30  ;;  %v1904_v30 = vsub.s32 7, %v4049_v44  ;;  %v1920_v44 = vld [vmem:[%s3937_s10] sm:$0xff] (!%p2325_p1) }
 0x9e9   : > { %v1706_v34 = vpack.c.bf16 %v1705_v33, %v1704_v32 }
 0x9eb   : > { %2459 = vmatmul.mubr.msk.bf16.vlgmr.msra.gmra.mrb[24].mxu0 %vm894_vm2, %v1706_v34 }
 0xabe   : > { %v1767_v43 = vpop.f32.mrb[24].mxu0 }
 0xabf   : > { %v1768_v45 = vadd.f32 %v2315_v42, %v1767_v43  ;;  %v2460_v46 = vpop.f32.mrb[25].mxu0 }
 0xac0   : > { %v1770_v48 = vpop.f32.mrb[26].mxu0  ;;  %v1921_v46 = vld [vmem:[%s3937_s10 + $0x8] sm:$0xff] (!%p2325_p1) }
 0xac1   : > { %v1776_v49 = vmul.f32 0.044715, %v1768_v45  ;;  %v1771_v50 = vadd.f32 %v2315_v42, %v1770_v48  ;;  %v2461_v51 = vpop.f32.mrb[27].mxu0  ;;  %v1774_v62 = vmul.f32 0.5, %v1768_v45  ;;  %v1922_v48 = vld [vmem:[#allocation2] sm:$0xff] (!%p2325_p1) }
 0xac3   : > { %v1778_v52 = vmul.f32 %v1776_v49, %v1768_v45  ;;  %v1777_v53 = vmul.f32 0.044715, %v1771_v50  ;;  %v1775_v63 = vmul.f32 0.5, %v1771_v50 }
 0xac5   : > { %v1780_v54 = vmul.f32 %v1778_v52, %v1768_v45  ;;  %v1779_v55 = vmul.f32 %v1777_v53, %v1771_v50 }
 0xac7   : > { %v1782_v56 = vadd.f32 %v1780_v54, %v1768_v45  ;;  %v1781_v57 = vmul.f32 %v1779_v55, %v1771_v50 }
 0xac9   : > { %v1784_v58 = vmul.f32 0.7978846, %v1782_v56  ;;  %v1783_v59 = vadd.f32 %v1781_v57, %v1771_v50  ;;  %v1923_v50 = vld [vmem:[#allocation2 + $0x8] sm:$0xff] (!%p2325_p1) }
 0xacb   : > { %2719 = vtanh.f32 %v1784_v58  ;;  %v1785_v36 = vmul.f32 0.7978846, %v1783_v59 }
 0xacd   : > { %2721 = vtanh.f32 %v1785_v36 }
 0xad5   : > { %v2720_v60 = vpop.eup %2719 }
 0xad6   : > { %v1788_v31 = vadd.f32 1.0, %v2720_v60 }
 0xad7   : > { %v2722_v61 = vpop.eup %2721 }
 0xad8   : > { %v1789_v0 = vadd.f32 1.0, %v2722_v61  ;;  %v1790_v1 = vmul.f32 %v1788_v31, %v1774_v62 }
 0xada   : > { %v1791_v2 = vmul.f32 %v1789_v0, %v1775_v63 }
 0xadc   : > { %v1792_v3 = vpack.c.bf16 %v1791_v2, %v1790_v1 }
 0xade   : > { %2471 = vmatmul.mubr.msk.bf16.vlgmr.msra.gmra.mrb[24].mxu1 %vm1829_vm6, %v1792_v3 }
 0xbb1   : > { %v1867_v6 = vpop.f32.mrb[24].mxu1 }
 0xbb2   : > { %v1868_v7 = vadd.f32 %v1867_v6, %v1804_v5  ;;  %v2472_v8 = vpop.f32.mrb[25].mxu1 }
 0xbb3   : > { %v1870_v9 = vpop.f32.mrb[26].mxu1 }
 0xbb4   : > { %v1871_v10 = vadd.f32 %v1870_v9, %v1804_v5  ;;  %v2473_v11 = vpop.f32.mrb[27].mxu1  ;;  %v1874_v12 = vadd.f32 %v1868_v7, %v1704_v32  ;;  %v1905_v32 = vrot.slane %v4055_v47, %v1904_v30  ;;  %v3274_v47 = vmov (!%p2325_p1), 0  }
 0xbb5   : > { %2727 = vset.pattern.permute.xlu0 (!%p2325_p1), %v3274_v47 }
 0xbb6   : > { %v1876_v39 = vsel %vm894_vm2, %v1874_v12, 0.0  ;;  %v1875_v13 = vadd.f32 %v1871_v10, %v1705_v33 }
 0xbb7   : > { %1877 = vadd.xlane.f32.xlu1 %v1876_v39 }
 0xbb8   : > { %v1879_v40 = vsel %vm894_vm2, %v1875_v13, 0.0 }
 0xbb9   : > { %1880 = vadd.xlane.f32.xlu0 %v1879_v40 }
 0xc44   : > { %v1878_v14 = vpop.xlane.xlu1 %1877 }
 0xc45   : > { %v1882_v15 = vmul.f32 0.03125, %v1878_v14 }
 0xc46   : > { %v1881_v16 = vpop.xlane.xlu0 %1880 }
 0xc47   : > { %v1884_v17 = vsub.f32 %v1874_v12, %v1882_v15  ;;  %v1883_v18 = vmul.f32 0.03125, %v1881_v16 }
 0xc49   : > { %v1885_v19 = vsub.f32 %v1875_v13, %v1883_v18  ;;  %v1886_v20 = vmul.f32 %v1884_v17, %v1884_v17 }
 0xc4b   : > { %v1888_v21 = vsel %vm894_vm2, %v1886_v20, 0.0  ;;  %v1887_v22 = vmul.f32 %v1885_v19, %v1885_v19 }
 0xc4c   : > { %1889 = vadd.xlane.f32.xlu1 %v1888_v21 }
 0xc4d   : > { %v1891_v23 = vsel %vm894_vm2, %v1887_v22, 0.0 }
 0xc4e   : > { %1892 = vadd.xlane.f32.xlu0 %v1891_v23 }
 0xc64   : > { %1928 = vperm.xlu0 (!%p2325_p1), %2727, %v1920_v44  }
 0xc68   : > { %1933 = vperm.xlu0 (!%p2325_p1), %2727, %v1921_v46  }
 0xcd9   : > { %v1890_v24 = vpop.xlane.xlu1 %1889 }
 0xcda   : > { %v1894_v25 = vmul.f32 0.03125, %v1890_v24 }
 0xcdb   : > { %v1893_v26 = vpop.xlane.xlu0 %1892 }
 0xcdc   : > { %v1896_v27 = vadd.f32 1e-12, %v1894_v25  ;;  %v1895_v28 = vmul.f32 0.03125, %v1893_v26 }
 0xcde   : > { %2723 = vrsqrt.f32 %v1896_v27  ;;  %v1897_v29 = vadd.f32 1e-12, %v1895_v28 }
 0xce0   : > { %2725 = vrsqrt.f32 %v1897_v29 }
 0xce3   : > { %v1929_v51 = vpop.permute.xlu0 (!%p2325_p1), %1928 }
 0xce7   : > { %v1934_v54 = vpop.permute.xlu0 (!%p2325_p1), %1933 }
 0xce8   : > { %v2724_v33 = vpop.eup %2723 }
 0xce9   : > { %v1900_v34 = vmul.f32 %v2724_v33, %v1884_v17 }
 0xcea   : > { %v2726_v35 = vpop.eup %2725 }
 0xceb   : > { %v1906_v38 = vmul.f32 %v1905_v32, %v1900_v34  ;;  %v1901_v41 = vmul.f32 %v2726_v35, %v1885_v19  ;;  %1919 = sbr.rel (%p2325_p1) target bundleno = 3335 (0xd07), region = 124 }
 0xced   : > { %v1912_v42 = vadd.f32 %v2324_v37, %v1906_v38  ;;  %v1907_v43 = vmul.f32 %v1905_v32, %v1901_v41 }
 0xcef   : > { %1914 = vst.msk [vmem:[#allocation3] sm:$0xff] %vm894_vm2, %v1912_v42  ;;  %v1913_v45 = vadd.f32 %v2324_v37, %v1907_v43  ;;  %v1924_v49 = vadd.f32 (!%p2325_p1), %v1922_v48, %v1912_v42 }
 0xcf1   : > { %1915 = vst.msk [vmem:[#allocation3 + $0x8] sm:$0xff] %vm894_vm2, %v1913_v45  ;;  %v1936_v52 = vmul.f32 (!%p2325_p1), %v1929_v51, %v1924_v49  ;;  %v1925_v53 = vadd.f32 (!%p2325_p1), %v1923_v50, %v1913_v45 }
 0xcf3   : > { %v1938_v55 = vmul.f32 0.5, %v1936_v52  ;;  %v1937_v56 = vmul.f32 %v1934_v54, %v1925_v53 }
 0xcf5   : > { %v1939_v57 = vmul.f32 0.5, %v1937_v56  ;;  %v1940_v58 = vsel %vm894_vm2, %v1938_v55, 0.0 }
 0xcf7   : > { %v1941_v59 = vsel %vm894_vm2, %v1939_v57, 0.0 }
 0xcf8   : > { %v1942_v36 = vadd.f32 %v1941_v59, %v1940_v58 }
 0xcfa   : > { %v1943_v60 = vrot.slane %v1942_v36, 4 }
 0xcfc   : > { %v1944_v31 = vadd.f32 %v1943_v60, %v1942_v36 }
 0xcfe   : > { %v1945_v61 = vrot.slane %v1944_v31, 2 }
 0xd00   : > { %v1946_v62 = vadd.f32 %v1945_v61, %v1944_v31 }
 0xd02   : > { %v1947_v63 = vrot.slane %v1946_v62, 1 }
 0xd04   : > { %v1948_v0 = vadd.f32 %v1947_v63, %v1946_v62 }
 0xd06   : > { %1950 = vst.msk [vmem:[%s816_s5] sm:$0x1] %vm1949_vm7, %v1948_v0 }
 0xd07 PF: > { %s4379_s28 = sld [smem:[#allocation38_spill]]  ;;  %s4380_s21 = sld [smem:[#allocation56_spill]] }
 0xd08   : > { %s1964_s6 = sshll.u32 %s816_s5, 4  ;;  %s1952_s30 = scalar_lea.sflag [#allocation6], %s3915_s22  ;;  %s1965_s6 = int_to_ptr.vmem [resolvable:$true] %s1964_s6 }
 0xd09   : > { %s3086_s9 = scalar_lea.vmem %s1965_s6, 16  ;;  %p4382_p4 = scmp.ne.s32.totalorder %s4358_s14, 0 }
 0xd0a   : > { %p3087_p0 = scmp.ne.s32.totalorder %s1965_s6, %s3086_s9  ;;  %s3275_s23 = smov [#allocation20]  }
 0xd0b   : > { %s3090_s4 = sshll.u32 %s3275_s23, 4  ;;  %s3091_s4 = int_to_ptr.vmem [resolvable:$false] %s3090_s4 }
 0xd0c   : > { %p3088_p10 = pnand %p3087_p0, %p4382_p4  ;;  %s3092_s2 = scalar_lea.vmem %s3091_s4, 32 }
 0xd0d   : > { %s2326_s10 = sshll.u32 %s4379_s28, 4  ;;  %s4381_s1 = smov %s4380_s21 }
 0xd0e   : > { %s4202_s12 = scalar_lea.hbm %s4380_s21, %s2326_s10  ;;  %p3089_p11 = pneg %p3088_p10 }
 0xd0f   : > { %p3093_p3 = scmp.lt.s32.totalorder %s1965_s6, %s3091_s4  ;;  %p3094_p5 = scmp.lt.s32.totalorder %s3092_s2, %s3086_s9 }
 0xd11   : > { %p3095_p12 = por %p3094_p5, %p3093_p3 }
 0xd13   : > { %p3096_p13 = pnand %p3095_p12, %p3089_p11 }
 0xd15   : > { %3099 = shalt.err (!%p3096_p13)
}
 0xd16   : > { %s3100_s22 = scalar_lea.hbm %s4202_s12, 16  ;;  %s3104_s0 = scalar_lea.hbm %s4381_s1, 32 }
 0xd17   : > { %p3101_p7 = scmp.ne.s32.totalorder %s4202_s12, %s3100_s22  ;;  %p3105_p2 = scmp.lt.u32.totalorder %s4202_s12, %s4381_s1 }
 0xd18   : > { %p3106_p6 = scmp.lt.u32.totalorder %s3104_s0, %s3100_s22  ;;  %p3108_p0 = scmp.lt.u32.totalorder %s3100_s22, %s4202_s12 }
 0xd19   : > { %p3102_p8 = pnand %p3101_p7, %p4382_p4 }
 0xd1a   : > { %p3107_p1 = por %p3106_p6, %p3105_p2 }
 0xd1b   : > { %p3103_p9 = pneg %p3102_p8 }
 0xd1c   : > { %p3109_p10 = por %p3108_p0, %p3107_p1 }
 0xd1e   : > { %p3110_p11 = pnand %p3109_p10, %p3103_p9 }
 0xd20   : > { %3113 = shalt.err (!%p3110_p11)
}
 0xd21   : > { %2500 = dma.vmem_to_hbm [thread:$0]  (%p4382_p4), %s1965_s6, 16, %s4202_s12, %s1952_s30  }
 0xd22 PF: > { %s4383_s20 = sld [smem:[#allocation33_spill]]  ;;  %p2547_p3 = scmp.ge.s32.totalorder %s3248_s13, 2 }
 0xd23   : > { %s1976_s27 = sand.u32 1, %s3220_s24  }
 0xd24   : > { %s1977_s15 = scalar_lea.sflag [#allocation6], %s1976_s27 }
 0xd28   : > { %p4384_p5 = scmp.ne.s32.totalorder %s4383_s20, 0 }
 0xd2a   : > { %p2541_p12 = pnand %p2547_p3, %p4384_p5 }
 0xd2c   : > { %3203 = dma.done.wait (!%p2541_p12), %s1977_s15, 16  }
 0xd2d   : > { %3205 = vsyncadd (!%p2541_p12), %s1977_s15, 4294967280  ;;  %s32_s13 = sadd.s32 1, %s3248_s13   ;;  %s4385_s21 = sld [smem:[#allocation34_spill]] }
 0xd2e   : > { %p29_p13 = scmp.ge.s32.totalorder %s32_s13, 6   ;;  %s4386_s22 = sld [smem:[#allocation35_spill]] }
 0xd2f   : > { %s4387_s23 = sld [smem:[#allocation42_spill]]  ;;  %s4388_s14 = sld [smem:[#allocation36_spill]] }
 0xd30   : > { %s4389_s26 = sld [smem:[#allocation43_spill]]  ;;  %s4390_s28 = sld [smem:[#allocation39_spill]] }
 0xd31   : > { %s4391_s17 = sld [smem:[#allocation40_spill]]  ;;  %s4392_s30 = sld [smem:[#allocation41_spill]] }
 0xd32   : > { %s4393_s24 = smov %s3224_s25  ;;  %s4395_s27 = smov %s3240_s29 }
 0xd33   :  { %31 = sbr.rel (!%p29_p13) target bundleno = 26 (0x1a), region = 237 }
 0xd35   : > { %s4394_s25 = smov %s4388_s14 }
 0xd37   : > { %s4396_s29 = smov %s4391_s17 }
 0xd3a   :  { %1981 = vsyncpa [#allocation5], 1 }
 0xd3b   :  { %1983 = vsyncpa [#allocation5 + $0x1], 1 }
 0xd3c   :  { %1984 = vsyncpa [#allocation8], 1 }
 0xd3d   :  { %1986 = vsyncpa [#allocation8 + $0x1], 1 }
 0xd3e   :  { %1987 = vsyncpa [#allocation11], 1 }
 0xd3f   :  { %1988 = vsyncpa [#allocation6], 1 }
 0xd40   :  { %1990 = vsyncpa [#allocation6 + $0x1], 1 }

</bundles_post_ra>
